<compile_context>
chip_gen: v6e
topology: v6e:2x2x1
jax: 0.10.0
libtpu: 0.0.40
codegen_flags: <defaults>
</compile_context>

<pallas_src>
import functools
import math

import jax
import jax.numpy as jnp
from jax.experimental import pallas as pl
from jax.experimental.pallas import tpu as pltpu

# ----------------------------- config -------------------------------------
PATCH = 14
DIM = 128          # embedding dim ("num_channels" of the backbone)
HEADS = 4
HEAD_DIM = DIM // HEADS
MLP = 4 * DIM
DEPTH = 2
EPS = 1e-6         # DINOv2 LayerNorm eps

KRAW = 3 * PATCH * PATCH             # 588 unfolded patch features
KPAD = ((KRAW + 127) // 128) * 128   # 640, 128-aligned contraction dim


# --------------------------- kernel helpers --------------------------------
def _ln(x, g, b):
    """PyTorch-style LayerNorm over the last axis (biased variance), f32 math."""
    mu = jnp.mean(x, axis=-1, keepdims=True)
    var = jnp.mean(jnp.square(x - mu), axis=-1, keepdims=True)
    return (x - mu) * jax.lax.rsqrt(var + EPS) * g + b


def _erf(x):
    """Abramowitz-Stegun 7.1.26 rational erf approximation (|err| < 1.5e-7).

    Uses only mul/add/div/exp/abs/where so it lowers cleanly in Mosaic while matching
    torch.nn.GELU()'s exact-erf definition to ~f32 precision.
    """
    a1, a2, a3, a4, a5 = 0.254829592, -0.284496736, 1.421413741, -1.453152027, 1.061405429
    p = 0.3275911
    ax = jnp.abs(x)
    t = 1.0 / (1.0 + p * ax)
    poly = ((((a5 * t + a4) * t + a3) * t + a2) * t + a1) * t
    y = 1.0 - poly * jnp.exp(-ax * ax)
    return jnp.where(x >= 0, y, -y)


def _gelu(x):
    """Exact (erf-based) GELU, matching torch.nn.GELU() default."""
    return 0.5 * x * (1.0 + _erf(x * (1.0 / math.sqrt(2.0))))


# ------------------------------ kernel --------------------------------------
def stack_kernel(patches_ref, patch_w_ref, tok_add_ref, vec_ref,
                 qkv_w_ref, qkv_b_ref, proj_w_ref,
                 fc1_w_ref, fc1_b_ref, fc2_w_ref, norm_ref, o_ref,
                 *, n_pad, n_valid, num_heads, head_dim):
    """Patch-embed + full transformer stack + final LayerNorm for ONE batch element.

    grid = (batch, depth); tokens for the current batch element stay resident in
    o_ref (VMEM) across the inner (arbitrary) depth axis.

    patches: [n_pad, KPAD] bf16   row-aligned to tokens (row 0 and pad rows are zero)
    patch_w: [KPAD, D]     bf16
    tok_add: [n_pad, D]    f32    row 0 = cls+pos0, rows 1..Np = pos+patch_bias, else 0
    vec:     [8, D]        f32    0 ln1_g, 1 ln1_b, 2 proj_b, 4 ln2_g, 5 ln2_b, 6 fc2_b
    qkv_w:   [D, 3D] bf16 (attn scale folded into q cols)   qkv_b: [1, 3D] f32
    proj_w:  [D, D]  bf16 (LayerScale ls1 folded)
    fc1_w:   [D, MLP] bf16   fc1_b: [1, MLP] f32
    fc2_w:   [MLP, D] bf16 (LayerScale ls2 folded)
    norm:    [2, D]  f32   final LayerNorm (gamma, beta)
    o:       [n_pad, D] f32  resident token block / output
    """
    l = pl.program_id(1)
    depth = pl.num_programs(1)
    d = num_heads * head_dim

    # ---- l == 0: fused patch embed + cls token + pos_embed (one store) ----
    @pl.when(l == 0)
    def _():
        emb = jnp.dot(patches_ref[...], patch_w_ref[...],
                      preferred_element_type=jnp.float32)        # (n_pad, D) f32
        o_ref[...] = emb + tok_add_ref[...]

    x = o_ref[...]                                               # (n_pad, D) f32

    vec = vec_ref[...]
    ln1_g, ln1_b = vec[0:1, :], vec[1:2, :]
    proj_b = vec[2:3, :]
    ln2_g, ln2_b = vec[4:5, :], vec[5:6, :]
    fc2_b = vec[6:7, :]

    # additive key-padding mask, layer-invariant, hoisted out of the head loop
    col = jax.lax.broadcasted_iota(jnp.int32, (n_pad, n_pad), 1)
    kmask = jnp.where(col < n_valid, 0.0, -1e30).astype(jnp.float32)

    # ------------------- attention branch -------------------
    h = _ln(x, ln1_g, ln1_b).astype(jnp.bfloat16)
    qkv = (jnp.dot(h, qkv_w_ref[...], preferred_element_type=jnp.float32)
           + qkv_b_ref[...]).astype(jnp.bfloat16)                # (n_pad, 3D) bf16, one cast

    outs = []
    for hh in range(num_heads):
        q_h = qkv[:, hh * head_dim:(hh + 1) * head_dim]              # (n_pad, hd) bf16 (scaled)
        k_h = qkv[:, d + hh * head_dim:d + (hh + 1) * head_dim]
        v_h = qkv[:, 2 * d + hh * head_dim:2 * d + (hh + 1) * head_dim]
        s = jax.lax.dot_general(q_h, k_h, (((1,), (1,)), ((), ())),
                                preferred_element_type=jnp.float32)  # (n_pad, n_pad) f32
        s = s + kmask
        s = s - jnp.max(s, axis=-1, keepdims=True)
        e = jnp.exp(s)
        p = e * pl.reciprocal(jnp.sum(e, axis=-1, keepdims=True), approx=True)
        outs.append(jnp.dot(p.astype(jnp.bfloat16), v_h,
                            preferred_element_type=jnp.float32))     # (n_pad, hd) f32
    attn = jnp.concatenate(outs, axis=-1)                            # (n_pad, D) f32

    proj = jnp.dot(attn.astype(jnp.bfloat16), proj_w_ref[...],
                   preferred_element_type=jnp.float32) + proj_b
    x = x + proj                                  # LayerScale ls1 folded into proj_w/proj_b

    # ------------------- MLP branch -------------------
    h2 = _ln(x, ln2_g, ln2_b).astype(jnp.bfloat16)
    m = jnp.dot(h2, fc1_w_ref[...],
                preferred_element_type=jnp.float32) + fc1_b_ref[...]
    m = _gelu(m).astype(jnp.bfloat16)
    m = jnp.dot(m, fc2_w_ref[...],
                preferred_element_type=jnp.float32) + fc2_b
    x = x + m                                     # LayerScale ls2 folded into fc2_w/fc2_b

    # single store per step: plain residual on intermediate layers, fused final LN on last
    @pl.when(l != depth - 1)
    def _():
        o_ref[...] = x

    @pl.when(l == depth - 1)
    def _():
        norm = norm_ref[...]
        o_ref[...] = _ln(x, norm[0:1, :], norm[1:2, :])
    # TODO(synk): padded token rows are left un-zeroed (harmless: their key columns are
    # masked and they are dropped in the wrapper); zero them here if checkpoints with
    # large biases ever push them toward inf/nan.


# ----------------------------- wrapper --------------------------------------
def transformer_stack(patches, tok_add, params, batch, n_pad, n_valid):
    kernel = functools.partial(stack_kernel, n_pad=n_pad, n_valid=n_valid,
                               num_heads=HEADS, head_dim=HEAD_DIM)
    return pl.pallas_call(
        kernel,
        out_shape=jax.ShapeDtypeStruct((batch * n_pad, DIM), jnp.float32),
        grid=(batch, DEPTH),
        in_specs=[
            pl.BlockSpec((n_pad, KPAD), lambda b, l: (b, 0)),            # patches (row-aligned)
            pl.BlockSpec((KPAD, DIM), lambda b, l: (0, 0)),              # patch_w
            pl.BlockSpec((n_pad, DIM), lambda b, l: (0, 0)),             # tok_add slab
            pl.BlockSpec((None, 8, DIM), lambda b, l: (l, 0, 0)),        # packed per-layer vectors
            pl.BlockSpec((None, DIM, 3 * DIM), lambda b, l: (l, 0, 0)),  # qkv_w (scale folded)
            pl.BlockSpec((None, 1, 3 * DIM), lambda b, l: (l, 0, 0)),    # qkv_b
            pl.BlockSpec((None, DIM, DIM), lambda b, l: (l, 0, 0)),      # proj_w (ls1 folded)
            pl.BlockSpec((None, DIM, MLP), lambda b, l: (l, 0, 0)),      # fc1_w
            pl.BlockSpec((None, 1, MLP), lambda b, l: (l, 0, 0)),        # fc1_b
            pl.BlockSpec((None, MLP, DIM), lambda b, l: (l, 0, 0)),      # fc2_w (ls2 folded)
            pl.BlockSpec((2, DIM), lambda b, l: (0, 0)),                 # final norm
        ],
        out_specs=pl.BlockSpec((n_pad, DIM), lambda b, l: (b, 0)),       # resident tokens
        compiler_params=pltpu.CompilerParams(
            dimension_semantics=("parallel", "arbitrary")),
    )(patches, params["patch_w"], tok_add, params["vec"], params["qkv_w"],
      params["qkv_b"], params["proj_w"], params["fc1_w"], params["fc1_b"],
      params["fc2_w"], params["norm"])
    # TODO(synk): at real sizes, tile fc1/fc2 over the MLP dim (extra grid axis or
    # pltpu.emit_pipeline) and set vmem_limit_bytes (v7x: 64 MiB physical VMEM).


# --------------------------- parameter init ---------------------------------
def init_params(key, num_patches):
    def nxt():
        nonlocal key
        key, sub = jax.random.split(key)
        return sub

    def normal(shape, std=0.02):
        return (std * jax.random.normal(nxt(), shape)).astype(jnp.float32)

    scale = HEAD_DIM ** -0.5
    ls1 = jnp.ones((DEPTH, DIM), jnp.float32)   # LayerScale, init_values=1
    ls2 = jnp.ones((DEPTH, DIM), jnp.float32)

    # qkv: fold the attention scale into the q slice (weights and bias), then cast bf16.
    qkv_w = normal((DEPTH, DIM, 3 * DIM))
    qkv_w = qkv_w.at[:, :, :DIM].multiply(scale)
    qkv_b = jnp.zeros((DEPTH, 1, 3 * DIM), jnp.float32)
    qkv_b = qkv_b.at[:, :, :DIM].multiply(scale)

    # proj / fc2: fold LayerScale into output columns and biases (exact here: ls == 1).
    proj_w = normal((DEPTH, DIM, DIM)) * ls1[:, None, :]
    proj_b = jnp.zeros((DEPTH, DIM), jnp.float32) * ls1
    fc2_w = normal((DEPTH, MLP, DIM)) * ls2[:, None, :]
    fc2_b = jnp.zeros((DEPTH, DIM), jnp.float32) * ls2

    # packed per-block (1, D) vectors:
    #   0 ln1_g, 1 ln1_b, 2 proj_b(ls-folded), 3 unused,
    #   4 ln2_g, 5 ln2_b, 6 fc2_b(ls-folded), 7 unused
    vec = jnp.zeros((DEPTH, 8, DIM), jnp.float32)
    vec = vec.at[:, 0, :].set(1.0)      # ln1 gamma
    vec = vec.at[:, 2, :].set(proj_b)
    vec = vec.at[:, 4, :].set(1.0)      # ln2 gamma
    vec = vec.at[:, 6, :].set(fc2_b)

    patch_w = jnp.zeros((KPAD, DIM), jnp.float32).at[:KRAW, :].set(normal((KRAW, DIM)))

    params = {
        "patch_w": patch_w.astype(jnp.bfloat16),
        "patch_b": jnp.zeros((DIM,), jnp.float32),
        "cls_token": normal((DIM,)),
        # pos_embed defined directly at the target grid (bicubic interpolation of the
        # 518/14 grid is a no-op here since sizes match by construction)
        "pos_embed": normal((1 + num_patches, DIM)),
        "norm": jnp.concatenate(
            [jnp.ones((1, DIM), jnp.float32), jnp.zeros((1, DIM), jnp.float32)], axis=0),
        "vec": vec,
        "qkv_w": qkv_w.astype(jnp.bfloat16),
        "qkv_b": qkv_b,                              # f32 (added before the bf16 cast)
        "proj_w": proj_w.astype(jnp.bfloat16),
        "fc1_w": normal((DEPTH, DIM, MLP)).astype(jnp.bfloat16),
        "fc1_b": jnp.zeros((DEPTH, 1, MLP), jnp.float32),
        "fc2_w": fc2_w.astype(jnp.bfloat16),
    }
    return params


# ------------------------------ forward -------------------------------------
def dinov2_forward(x, params):
    """Matches DINOv2.forward with norm_layer=True, return_token=True,
    layers_to_crop=[], return_token_list=False, adapter=None."""
    B, C, H, W = x.shape
    hp, wp = H // PATCH, W // PATCH
    Np = hp * wp
    n_valid = 1 + Np                              # cls + patch tokens
    n_pad = ((n_valid + 7) // 8) * 8              # sublane-aligned token count

    # --- unfold 14x14 patches in (channel, kh, kw) order (Conv2d flattening) ---
    patches = (
        x.reshape(B, C, hp, PATCH, wp, PATCH)
         .transpose(0, 2, 4, 1, 3, 5)             # (B, hp, wp, C, kh, kw)
         .reshape(B, Np, KRAW)
    )
    # row-align patches to the padded token layout: row 0 (cls) and pad rows are zero;
    # zero-pad the contraction dim 588 -> 640 (128-aligned).
    patches = jnp.pad(patches, ((0, 0), (1, n_pad - 1 - Np), (0, KPAD - KRAW)))
    patches = patches.reshape(B * n_pad, KPAD).astype(jnp.bfloat16)

    # additive token slab: row 0 = cls + pos[0]; rows 1..Np = pos[j] + patch bias; else 0.
    tok_add = jnp.zeros((n_pad, DIM), jnp.float32)
    tok_add = tok_add.at[0].set(params["cls_token"] + params["pos_embed"][0])
    tok_add = tok_add.at[1:1 + Np].set(params["pos_embed"][1:1 + Np] + params["patch_b"])

    # --- patch embed + transformer blocks + final norm (single fused kernel) ---
    tokens = transformer_stack(patches, tok_add, params, B, n_pad, n_valid)  # (B*n_pad, D)

    # --- split cls token / feature map ---
    tokens = tokens.reshape(B, n_pad, DIM)
    t = tokens[:, 0, :]                                            # [B, C]
    f = tokens[:, 1:1 + Np, :].reshape(B, hp, wp, DIM)             # b h w c
    f = jnp.transpose(f, (0, 3, 1, 2))                             # b c h w
    return t, f
    # TODO(synk): return_token_list / adapter / layers_to_crop paths not exercised.


# ------------------------------- main ---------------------------------------
if __name__ == "__main__":
    key = jax.random.PRNGKey(0)
    B, Cin, H, W = 2, 3, 28, 28        # H, W divisible by 14 -> 2x2 patch grid
    key, xk = jax.random.split(key)
    x = jax.random.normal(xk, (B, Cin, H, W), dtype=jnp.float32)

    params = init_params(key, num_patches=(H // PATCH) * (W // PATCH))

    fwd = jax.jit(dinov2_forward)
    t, f = fwd(x, params)
    jax.block_until_ready((t, f))

    assert t.shape == (B, DIM), t.shape
    assert f.shape == (B, DIM, H // PATCH, W // PATCH), f.shape
    assert jnp.all(jnp.isfinite(t)) and jnp.all(jnp.isfinite(f))
    print("KERNEL_OK")
</pallas_src>

<mosaic_0001>
module attributes {stable_mosaic.version = 11 : i64} {
  func.func @stack_kernel(%arg0: i32, %arg1: i32, %arg2: memref<8x640xbf16, #tpu.memory_space<vmem>>, %arg3: memref<640x128xbf16, #tpu.memory_space<vmem>>, %arg4: memref<8x128xf32, #tpu.memory_space<vmem>>, %arg5: memref<1x8x128xf32, #tpu.memory_space<vmem>>, %arg6: memref<1x128x384xbf16, #tpu.memory_space<vmem>>, %arg7: memref<1x1x384xf32, #tpu.memory_space<vmem>>, %arg8: memref<1x128x128xbf16, #tpu.memory_space<vmem>>, %arg9: memref<1x128x512xbf16, #tpu.memory_space<vmem>>, %arg10: memref<1x1x512xf32, #tpu.memory_space<vmem>>, %arg11: memref<1x512x128xbf16, #tpu.memory_space<vmem>>, %arg12: memref<2x128xf32, #tpu.memory_space<vmem>>, %arg13: memref<8x128xf32, #tpu.memory_space<vmem>>) attributes {dimension_semantics = [#tpu.dimension_semantics<parallel>, #tpu.dimension_semantics<arbitrary>], iteration_bounds = array<i64: 2, 2>, scalar_prefetch = 0 : i64, scratch_operands = 0 : i64, tpu.core_type = #tpu.core_type<tc>, window_params = [{transform_indices = @transform_0, window_bounds = array<i64: 8, 640>}, {pipeline_mode = #tpu.pipeline_mode<synchronous>, transform_indices = @transform_1, window_bounds = array<i64: 640, 128>}, {pipeline_mode = #tpu.pipeline_mode<synchronous>, transform_indices = @transform_2, window_bounds = array<i64: 8, 128>}, {transform_indices = @transform_3, window_bounds = array<i64: 1, 8, 128>}, {transform_indices = @transform_4, window_bounds = array<i64: 1, 128, 384>}, {transform_indices = @transform_5, window_bounds = array<i64: 1, 1, 384>}, {transform_indices = @transform_6, window_bounds = array<i64: 1, 128, 128>}, {transform_indices = @transform_7, window_bounds = array<i64: 1, 128, 512>}, {transform_indices = @transform_8, window_bounds = array<i64: 1, 1, 512>}, {transform_indices = @transform_9, window_bounds = array<i64: 1, 512, 128>}, {pipeline_mode = #tpu.pipeline_mode<synchronous>, transform_indices = @transform_10, window_bounds = array<i64: 2, 128>}, {transform_indices = @transform_11, window_bounds = array<i64: 8, 128>}]} {
    %c0_i32 = arith.constant 0 : i32
    %0 = arith.cmpi eq, %arg1, %c0_i32 : i32
    %1 = arith.extui %0 : i1 to i32
    %c0_i32_0 = arith.constant 0 : i32
    %2 = arith.cmpi ne, %1, %c0_i32_0 : i32
    scf.if %2 {
      %c0_72 = arith.constant 0 : index
      %c0_73 = arith.constant 0 : index
      %208 = vector.load %arg2[%c0_72, %c0_73] : memref<8x640xbf16, #tpu.memory_space<vmem>>, vector<8x640xbf16>
      %c0_74 = arith.constant 0 : index
      %c0_75 = arith.constant 0 : index
      %209 = vector.load %arg3[%c0_74, %c0_75] : memref<640x128xbf16, #tpu.memory_space<vmem>>, vector<640x128xbf16>
      %cst_76 = arith.constant dense<0.000000e+00> : vector<8x128xf32>
      %210 = tpu.matmul %208, %209, %cst_76 {dimension_numbers = #tpu.dot_dimension_numbers<[1], [0], [0], [1], [0, 0, 1, 1], [], []>} : vector<8x640xbf16>, vector<640x128xbf16>, vector<8x128xf32> -> vector<8x128xf32>
      %c0_77 = arith.constant 0 : index
      %c0_78 = arith.constant 0 : index
      %211 = vector.load %arg4[%c0_77, %c0_78] : memref<8x128xf32, #tpu.memory_space<vmem>>, vector<8x128xf32>
      %212 = arith.addf %210, %211 : vector<8x128xf32>
      %c0_79 = arith.constant 0 : index
      %c0_80 = arith.constant 0 : index
      %213 = vector.load %arg13[%c0_79, %c0_80] : memref<8x128xf32, #tpu.memory_space<vmem>>, vector<8x128xf32>
      tpu.vector_store %arg13[%c0_79, %c0_80], %212 {strides = array<i32>} : memref<8x128xf32, #tpu.memory_space<vmem>>, vector<8x128xf32>,
    } else {
    }
    %c0 = arith.constant 0 : index
    %c0_1 = arith.constant 0 : index
    %3 = vector.load %arg13[%c0, %c0_1] : memref<8x128xf32, #tpu.memory_space<vmem>>, vector<8x128xf32>
    %c0_2 = arith.constant 0 : index
    %c0_3 = arith.constant 0 : index
    %c0_4 = arith.constant 0 : index
    %4 = vector.load %arg5[%c0_2, %c0_3, %c0_4] : memref<1x8x128xf32, #tpu.memory_space<vmem>>, vector<1x8x128xf32>
    %5 = vector.shape_cast %4 : vector<1x8x128xf32> to vector<8x128xf32>
    %6 = vector.extract_strided_slice %5 {offsets = [0, 0], sizes = [1, 128], strides = [1, 1]} : vector<8x128xf32> to vector<1x128xf32>
    %7 = vector.extract_strided_slice %5 {offsets = [1, 0], sizes = [1, 128], strides = [1, 1]} : vector<8x128xf32> to vector<1x128xf32>
    %8 = vector.extract_strided_slice %5 {offsets = [2, 0], sizes = [1, 128], strides = [1, 1]} : vector<8x128xf32> to vector<1x128xf32>
    %9 = vector.extract_strided_slice %5 {offsets = [4, 0], sizes = [1, 128], strides = [1, 1]} : vector<8x128xf32> to vector<1x128xf32>
    %10 = vector.extract_strided_slice %5 {offsets = [5, 0], sizes = [1, 128], strides = [1, 1]} : vector<8x128xf32> to vector<1x128xf32>
    %11 = vector.extract_strided_slice %5 {offsets = [6, 0], sizes = [1, 128], strides = [1, 1]} : vector<8x128xf32> to vector<1x128xf32>
    %12 = tpu.iota {dimensions = array<i32: 1>} : vector<8x8xi32>
    %c5_i32 = arith.constant 5 : i32
    %13 = vector.broadcast %c5_i32 : i32 to vector<8x8xi32>
    %14 = arith.cmpi slt, %12, %13 : vector<8x8xi32>
    %cst = arith.constant 0.000000e+00 : f32
    %cst_5 = arith.constant -1.000000e+30 : f32
    %15 = vector.broadcast %cst : f32 to vector<8x8xf32>
    %16 = vector.broadcast %cst_5 : f32 to vector<8x8xf32>
    %17 = arith.select %14, %15, %16 : vector<8x8xi1>, vector<8x8xf32>
    %cst_6 = arith.constant dense<0.000000e+00> : vector<8xf32>
    %18 = vector.multi_reduction <add>, %3, %cst_6 [1] : vector<8x128xf32> to vector<8xf32>
    %19 = vector.shape_cast %18 : vector<8xf32> to vector<8x1xf32>
    %cst_7 = arith.constant 1.280000e+02 : f32
    %20 = vector.broadcast %cst_7 : f32 to vector<8x1xf32>
    %21 = arith.divf %19, %20 : vector<8x1xf32>
    %22 = vector.broadcast %21 : vector<8x1xf32> to vector<8x128xf32>
    %23 = arith.subf %3, %22 : vector<8x128xf32>
    %24 = arith.mulf %23, %23 : vector<8x128xf32>
    %cst_8 = arith.constant dense<0.000000e+00> : vector<8xf32>
    %25 = vector.multi_reduction <add>, %24, %cst_8 [1] : vector<8x128xf32> to vector<8xf32>
    %26 = vector.shape_cast %25 : vector<8xf32> to vector<8x1xf32>
    %cst_9 = arith.constant 1.280000e+02 : f32
    %27 = vector.broadcast %cst_9 : f32 to vector<8x1xf32>
    %28 = arith.divf %26, %27 : vector<8x1xf32>
    %29 = vector.broadcast %21 : vector<8x1xf32> to vector<8x128xf32>
    %30 = arith.subf %3, %29 : vector<8x128xf32>
    %cst_10 = arith.constant 9.99999997E-7 : f32
    %31 = vector.broadcast %cst_10 : f32 to vector<8x1xf32>
    %32 = arith.addf %28, %31 : vector<8x1xf32>
    %33 = math.rsqrt %32 : vector<8x1xf32>
    %34 = vector.broadcast %33 : vector<8x1xf32> to vector<8x128xf32>
    %35 = arith.mulf %30, %34 : vector<8x128xf32>
    %36 = vector.broadcast %6 : vector<1x128xf32> to vector<8x128xf32>
    %37 = arith.mulf %35, %36 : vector<8x128xf32>
    %38 = vector.broadcast %7 : vector<1x128xf32> to vector<8x128xf32>
    %39 = arith.addf %37, %38 : vector<8x128xf32>
    %40 = arith.truncf %39 : vector<8x128xf32> to vector<8x128xbf16>
    %c0_11 = arith.constant 0 : index
    %c0_12 = arith.constant 0 : index
    %c0_13 = arith.constant 0 : index
    %41 = vector.load %arg6[%c0_11, %c0_12, %c0_13] : memref<1x128x384xbf16, #tpu.memory_space<vmem>>, vector<1x128x384xbf16>
    %42 = vector.shape_cast %41 : vector<1x128x384xbf16> to vector<128x384xbf16>
    %cst_14 = arith.constant dense<0.000000e+00> : vector<8x384xf32>
    %43 = tpu.matmul %40, %42, %cst_14 {dimension_numbers = #tpu.dot_dimension_numbers<[1], [0], [0], [1], [0, 0, 1, 1], [], []>} : vector<8x128xbf16>, vector<128x384xbf16>, vector<8x384xf32> -> vector<8x384xf32>
    %c0_15 = arith.constant 0 : index
    %c0_16 = arith.constant 0 : index
    %c0_17 = arith.constant 0 : index
    %44 = vector.load %arg7[%c0_15, %c0_16, %c0_17] : memref<1x1x384xf32, #tpu.memory_space<vmem>>, vector<1x1x384xf32>
    %45 = vector.shape_cast %44 : vector<1x1x384xf32> to vector<1x384xf32>
    %46 = vector.broadcast %45 : vector<1x384xf32> to vector<8x384xf32>
    %47 = arith.addf %43, %46 : vector<8x384xf32>
    %48 = arith.truncf %47 : vector<8x384xf32> to vector<8x384xbf16>
    %49 = vector.extract_strided_slice %48 {offsets = [0, 0], sizes = [8, 32], strides = [1, 1]} : vector<8x384xbf16> to vector<8x32xbf16>
    %50 = vector.extract_strided_slice %48 {offsets = [0, 128], sizes = [8, 32], strides = [1, 1]} : vector<8x384xbf16> to vector<8x32xbf16>
    %51 = vector.extract_strided_slice %48 {offsets = [0, 256], sizes = [8, 32], strides = [1, 1]} : vector<8x384xbf16> to vector<8x32xbf16>
    %cst_18 = arith.constant dense<0.000000e+00> : vector<8x8xf32>
    %52 = tpu.matmul %49, %50, %cst_18 {dimension_numbers = #tpu.dot_dimension_numbers<[1], [1], [0], [0], [0, 0, 1, 0], [], []>} : vector<8x32xbf16>, vector<8x32xbf16>, vector<8x8xf32> -> vector<8x8xf32>
    %53 = arith.addf %52, %17 : vector<8x8xf32>
    %cst_19 = arith.constant dense<0xFF800000> : vector<8xf32>
    %54 = vector.multi_reduction <maximumf>, %53, %cst_19 [1] : vector<8x8xf32> to vector<8xf32>
    %55 = vector.shape_cast %54 : vector<8xf32> to vector<8x1xf32>
    %56 = vector.broadcast %55 : vector<8x1xf32> to vector<8x8xf32>
    %57 = arith.subf %53, %56 : vector<8x8xf32>
    %58 = math.exp %57 : vector<8x8xf32>
    %cst_20 = arith.constant dense<0.000000e+00> : vector<8xf32>
    %59 = vector.multi_reduction <add>, %58, %cst_20 [1] : vector<8x8xf32> to vector<8xf32>
    %60 = vector.shape_cast %59 : vector<8xf32> to vector<8x1xf32>
    %61 = tpu.reciprocal %60 {approx = true} : vector<8x1xf32> -> vector<8x1xf32>
    %62 = vector.broadcast %61 : vector<8x1xf32> to vector<8x8xf32>
    %63 = arith.mulf %58, %62 : vector<8x8xf32>
    %64 = arith.truncf %63 : vector<8x8xf32> to vector<8x8xbf16>
    %cst_21 = arith.constant dense<0.000000e+00> : vector<8x32xf32>
    %65 = tpu.matmul %64, %51, %cst_21 {dimension_numbers = #tpu.dot_dimension_numbers<[1], [0], [0], [1], [0, 0, 1, 1], [], []>} : vector<8x8xbf16>, vector<8x32xbf16>, vector<8x32xf32> -> vector<8x32xf32>
    %66 = vector.extract_strided_slice %48 {offsets = [0, 32], sizes = [8, 32], strides = [1, 1]} : vector<8x384xbf16> to vector<8x32xbf16>
    %67 = vector.extract_strided_slice %48 {offsets = [0, 160], sizes = [8, 32], strides = [1, 1]} : vector<8x384xbf16> to vector<8x32xbf16>
    %68 = vector.extract_strided_slice %48 {offsets = [0, 288], sizes = [8, 32], strides = [1, 1]} : vector<8x384xbf16> to vector<8x32xbf16>
    %cst_22 = arith.constant dense<0.000000e+00> : vector<8x8xf32>
    %69 = tpu.matmul %66, %67, %cst_22 {dimension_numbers = #tpu.dot_dimension_numbers<[1], [1], [0], [0], [0, 0, 1, 0], [], []>} : vector<8x32xbf16>, vector<8x32xbf16>, vector<8x8xf32> -> vector<8x8xf32>
    %70 = arith.addf %69, %17 : vector<8x8xf32>
    %cst_23 = arith.constant dense<0xFF800000> : vector<8xf32>
    %71 = vector.multi_reduction <maximumf>, %70, %cst_23 [1] : vector<8x8xf32> to vector<8xf32>
    %72 = vector.shape_cast %71 : vector<8xf32> to vector<8x1xf32>
    %73 = vector.broadcast %72 : vector<8x1xf32> to vector<8x8xf32>
    %74 = arith.subf %70, %73 : vector<8x8xf32>
    %75 = math.exp %74 : vector<8x8xf32>
    %cst_24 = arith.constant dense<0.000000e+00> : vector<8xf32>
    %76 = vector.multi_reduction <add>, %75, %cst_24 [1] : vector<8x8xf32> to vector<8xf32>
    %77 = vector.shape_cast %76 : vector<8xf32> to vector<8x1xf32>
    %78 = tpu.reciprocal %77 {approx = true} : vector<8x1xf32> -> vector<8x1xf32>
    %79 = vector.broadcast %78 : vector<8x1xf32> to vector<8x8xf32>
    %80 = arith.mulf %75, %79 : vector<8x8xf32>
    %81 = arith.truncf %80 : vector<8x8xf32> to vector<8x8xbf16>
    %cst_25 = arith.constant dense<0.000000e+00> : vector<8x32xf32>
    %82 = tpu.matmul %81, %68, %cst_25 {dimension_numbers = #tpu.dot_dimension_numbers<[1], [0], [0], [1], [0, 0, 1, 1], [], []>} : vector<8x8xbf16>, vector<8x32xbf16>, vector<8x32xf32> -> vector<8x32xf32>
    %83 = vector.extract_strided_slice %48 {offsets = [0, 64], sizes = [8, 32], strides = [1, 1]} : vector<8x384xbf16> to vector<8x32xbf16>
    %84 = vector.extract_strided_slice %48 {offsets = [0, 192], sizes = [8, 32], strides = [1, 1]} : vector<8x384xbf16> to vector<8x32xbf16>
    %85 = vector.extract_strided_slice %48 {offsets = [0, 320], sizes = [8, 32], strides = [1, 1]} : vector<8x384xbf16> to vector<8x32xbf16>
    %cst_26 = arith.constant dense<0.000000e+00> : vector<8x8xf32>
    %86 = tpu.matmul %83, %84, %cst_26 {dimension_numbers = #tpu.dot_dimension_numbers<[1], [1], [0], [0], [0, 0, 1, 0], [], []>} : vector<8x32xbf16>, vector<8x32xbf16>, vector<8x8xf32> -> vector<8x8xf32>
    %87 = arith.addf %86, %17 : vector<8x8xf32>
    %cst_27 = arith.constant dense<0xFF800000> : vector<8xf32>
    %88 = vector.multi_reduction <maximumf>, %87, %cst_27 [1] : vector<8x8xf32> to vector<8xf32>
    %89 = vector.shape_cast %88 : vector<8xf32> to vector<8x1xf32>
    %90 = vector.broadcast %89 : vector<8x1xf32> to vector<8x8xf32>
    %91 = arith.subf %87, %90 : vector<8x8xf32>
    %92 = math.exp %91 : vector<8x8xf32>
    %cst_28 = arith.constant dense<0.000000e+00> : vector<8xf32>
    %93 = vector.multi_reduction <add>, %92, %cst_28 [1] : vector<8x8xf32> to vector<8xf32>
    %94 = vector.shape_cast %93 : vector<8xf32> to vector<8x1xf32>
    %95 = tpu.reciprocal %94 {approx = true} : vector<8x1xf32> -> vector<8x1xf32>
    %96 = vector.broadcast %95 : vector<8x1xf32> to vector<8x8xf32>
    %97 = arith.mulf %92, %96 : vector<8x8xf32>
    %98 = arith.truncf %97 : vector<8x8xf32> to vector<8x8xbf16>
    %cst_29 = arith.constant dense<0.000000e+00> : vector<8x32xf32>
    %99 = tpu.matmul %98, %85, %cst_29 {dimension_numbers = #tpu.dot_dimension_numbers<[1], [0], [0], [1], [0, 0, 1, 1], [], []>} : vector<8x8xbf16>, vector<8x32xbf16>, vector<8x32xf32> -> vector<8x32xf32>
    %100 = vector.extract_strided_slice %48 {offsets = [0, 96], sizes = [8, 32], strides = [1, 1]} : vector<8x384xbf16> to vector<8x32xbf16>
    %101 = vector.extract_strided_slice %48 {offsets = [0, 224], sizes = [8, 32], strides = [1, 1]} : vector<8x384xbf16> to vector<8x32xbf16>
    %102 = vector.extract_strided_slice %48 {offsets = [0, 352], sizes = [8, 32], strides = [1, 1]} : vector<8x384xbf16> to vector<8x32xbf16>
    %cst_30 = arith.constant dense<0.000000e+00> : vector<8x8xf32>
    %103 = tpu.matmul %100, %101, %cst_30 {dimension_numbers = #tpu.dot_dimension_numbers<[1], [1], [0], [0], [0, 0, 1, 0], [], []>} : vector<8x32xbf16>, vector<8x32xbf16>, vector<8x8xf32> -> vector<8x8xf32>
    %104 = arith.addf %103, %17 : vector<8x8xf32>
    %cst_31 = arith.constant dense<0xFF800000> : vector<8xf32>
    %105 = vector.multi_reduction <maximumf>, %104, %cst_31 [1] : vector<8x8xf32> to vector<8xf32>
    %106 = vector.shape_cast %105 : vector<8xf32> to vector<8x1xf32>
    %107 = vector.broadcast %106 : vector<8x1xf32> to vector<8x8xf32>
    %108 = arith.subf %104, %107 : vector<8x8xf32>
    %109 = math.exp %108 : vector<8x8xf32>
    %cst_32 = arith.constant dense<0.000000e+00> : vector<8xf32>
    %110 = vector.multi_reduction <add>, %109, %cst_32 [1] : vector<8x8xf32> to vector<8xf32>
    %111 = vector.shape_cast %110 : vector<8xf32> to vector<8x1xf32>
    %112 = tpu.reciprocal %111 {approx = true} : vector<8x1xf32> -> vector<8x1xf32>
    %113 = vector.broadcast %112 : vector<8x1xf32> to vector<8x8xf32>
    %114 = arith.mulf %109, %113 : vector<8x8xf32>
    %115 = arith.truncf %114 : vector<8x8xf32> to vector<8x8xbf16>
    %cst_33 = arith.constant dense<0.000000e+00> : vector<8x32xf32>
    %116 = tpu.matmul %115, %102, %cst_33 {dimension_numbers = #tpu.dot_dimension_numbers<[1], [0], [0], [1], [0, 0, 1, 1], [], []>} : vector<8x8xbf16>, vector<8x32xbf16>, vector<8x32xf32> -> vector<8x32xf32>
    %117 = tpu.concatenate %65, %82, %99, %116 in 1 : vector<8x32xf32>, vector<8x32xf32>, vector<8x32xf32>, vector<8x32xf32> -> vector<8x128xf32>
    %118 = arith.truncf %117 : vector<8x128xf32> to vector<8x128xbf16>
    %c0_34 = arith.constant 0 : index
    %c0_35 = arith.constant 0 : index
    %c0_36 = arith.constant 0 : index
    %119 = vector.load %arg8[%c0_34, %c0_35, %c0_36] : memref<1x128x128xbf16, #tpu.memory_space<vmem>>, vector<1x128x128xbf16>
    %120 = vector.shape_cast %119 : vector<1x128x128xbf16> to vector<128x128xbf16>
    %cst_37 = arith.constant dense<0.000000e+00> : vector<8x128xf32>
    %121 = tpu.matmul %118, %120, %cst_37 {dimension_numbers = #tpu.dot_dimension_numbers<[1], [0], [0], [1], [0, 0, 1, 1], [], []>} : vector<8x128xbf16>, vector<128x128xbf16>, vector<8x128xf32> -> vector<8x128xf32>
    %122 = vector.broadcast %8 : vector<1x128xf32> to vector<8x128xf32>
    %123 = arith.addf %121, %122 : vector<8x128xf32>
    %124 = arith.addf %3, %123 : vector<8x128xf32>
    %cst_38 = arith.constant dense<0.000000e+00> : vector<8xf32>
    %125 = vector.multi_reduction <add>, %124, %cst_38 [1] : vector<8x128xf32> to vector<8xf32>
    %126 = vector.shape_cast %125 : vector<8xf32> to vector<8x1xf32>
    %cst_39 = arith.constant 1.280000e+02 : f32
    %127 = vector.broadcast %cst_39 : f32 to vector<8x1xf32>
    %128 = arith.divf %126, %127 : vector<8x1xf32>
    %129 = vector.broadcast %128 : vector<8x1xf32> to vector<8x128xf32>
    %130 = arith.subf %124, %129 : vector<8x128xf32>
    %131 = arith.mulf %130, %130 : vector<8x128xf32>
    %cst_40 = arith.constant dense<0.000000e+00> : vector<8xf32>
    %132 = vector.multi_reduction <add>, %131, %cst_40 [1] : vector<8x128xf32> to vector<8xf32>
    %133 = vector.shape_cast %132 : vector<8xf32> to vector<8x1xf32>
    %cst_41 = arith.constant 1.280000e+02 : f32
    %134 = vector.broadcast %cst_41 : f32 to vector<8x1xf32>
    %135 = arith.divf %133, %134 : vector<8x1xf32>
    %136 = vector.broadcast %128 : vector<8x1xf32> to vector<8x128xf32>
    %137 = arith.subf %124, %136 : vector<8x128xf32>
    %cst_42 = arith.constant 9.99999997E-7 : f32
    %138 = vector.broadcast %cst_42 : f32 to vector<8x1xf32>
    %139 = arith.addf %135, %138 : vector<8x1xf32>
    %140 = math.rsqrt %139 : vector<8x1xf32>
    %141 = vector.broadcast %140 : vector<8x1xf32> to vector<8x128xf32>
    %142 = arith.mulf %137, %141 : vector<8x128xf32>
    %143 = vector.broadcast %9 : vector<1x128xf32> to vector<8x128xf32>
    %144 = arith.mulf %142, %143 : vector<8x128xf32>
    %145 = vector.broadcast %10 : vector<1x128xf32> to vector<8x128xf32>
    %146 = arith.addf %144, %145 : vector<8x128xf32>
    %147 = arith.truncf %146 : vector<8x128xf32> to vector<8x128xbf16>
    %c0_43 = arith.constant 0 : index
    %c0_44 = arith.constant 0 : index
    %c0_45 = arith.constant 0 : index
    %148 = vector.load %arg9[%c0_43, %c0_44, %c0_45] : memref<1x128x512xbf16, #tpu.memory_space<vmem>>, vector<1x128x512xbf16>
    %149 = vector.shape_cast %148 : vector<1x128x512xbf16> to vector<128x512xbf16>
    %cst_46 = arith.constant dense<0.000000e+00> : vector<8x512xf32>
    %150 = tpu.matmul %147, %149, %cst_46 {dimension_numbers = #tpu.dot_dimension_numbers<[1], [0], [0], [1], [0, 0, 1, 1], [], []>} : vector<8x128xbf16>, vector<128x512xbf16>, vector<8x512xf32> -> vector<8x512xf32>
    %c0_47 = arith.constant 0 : index
    %c0_48 = arith.constant 0 : index
    %c0_49 = arith.constant 0 : index
    %151 = vector.load %arg10[%c0_47, %c0_48, %c0_49] : memref<1x1x512xf32, #tpu.memory_space<vmem>>, vector<1x1x512xf32>
    %152 = vector.shape_cast %151 : vector<1x1x512xf32> to vector<1x512xf32>
    %153 = vector.broadcast %152 : vector<1x512xf32> to vector<8x512xf32>
    %154 = arith.addf %150, %153 : vector<8x512xf32>
    %cst_50 = arith.constant 5.000000e-01 : f32
    %155 = vector.broadcast %cst_50 : f32 to vector<8x512xf32>
    %156 = arith.mulf %155, %154 : vector<8x512xf32>
    %cst_51 = arith.constant 0.707106769 : f32
    %157 = vector.broadcast %cst_51 : f32 to vector<8x512xf32>
    %158 = arith.mulf %154, %157 : vector<8x512xf32>
    %159 = math.absf %158 : vector<8x512xf32>
    %cst_52 = arith.constant 0.327591091 : f32
    %160 = vector.broadcast %cst_52 : f32 to vector<8x512xf32>
    %161 = arith.mulf %160, %159 : vector<8x512xf32>
    %cst_53 = arith.constant 1.000000e+00 : f32
    %162 = vector.broadcast %cst_53 : f32 to vector<8x512xf32>
    %163 = arith.addf %162, %161 : vector<8x512xf32>
    %cst_54 = arith.constant 1.000000e+00 : f32
    %164 = vector.broadcast %cst_54 : f32 to vector<8x512xf32>
    %165 = arith.divf %164, %163 : vector<8x512xf32>
    %cst_55 = arith.constant 1.06140542 : f32
    %166 = vector.broadcast %cst_55 : f32 to vector<8x512xf32>
    %167 = arith.mulf %166, %165 : vector<8x512xf32>
    %cst_56 = arith.constant -1.45315206 : f32
    %168 = vector.broadcast %cst_56 : f32 to vector<8x512xf32>
    %169 = arith.addf %167, %168 : vector<8x512xf32>
    %170 = arith.mulf %169, %165 : vector<8x512xf32>
    %cst_57 = arith.constant 1.42141378 : f32
    %171 = vector.broadcast %cst_57 : f32 to vector<8x512xf32>
    %172 = arith.addf %170, %171 : vector<8x512xf32>
    %173 = arith.mulf %172, %165 : vector<8x512xf32>
    %cst_58 = arith.constant -0.284496725 : f32
    %174 = vector.broadcast %cst_58 : f32 to vector<8x512xf32>
    %175 = arith.addf %173, %174 : vector<8x512xf32>
    %176 = arith.mulf %175, %165 : vector<8x512xf32>
    %cst_59 = arith.constant 0.254829586 : f32
    %177 = vector.broadcast %cst_59 : f32 to vector<8x512xf32>
    %178 = arith.addf %176, %177 : vector<8x512xf32>
    %179 = arith.mulf %178, %165 : vector<8x512xf32>
    %cst_60 = arith.constant 0.000000e+00 : f32
    %180 = vector.broadcast %cst_60 : f32 to vector<8x512xf32>
    %181 = arith.subf %180, %159 : vector<8x512xf32>
    %182 = arith.mulf %181, %159 : vector<8x512xf32>
    %183 = math.exp %182 : vector<8x512xf32>
    %184 = arith.mulf %179, %183 : vector<8x512xf32>
    %cst_61 = arith.constant 1.000000e+00 : f32
    %185 = vector.broadcast %cst_61 : f32 to vector<8x512xf32>
    %186 = arith.subf %185, %184 : vector<8x512xf32>
    %cst_62 = arith.constant 0.000000e+00 : f32
    %187 = vector.broadcast %cst_62 : f32 to vector<8x512xf32>
    %188 = arith.cmpf oge, %158, %187 : vector<8x512xf32>
    %cst_63 = arith.constant 0.000000e+00 : f32
    %189 = vector.broadcast %cst_63 : f32 to vector<8x512xf32>
    %190 = arith.subf %189, %186 : vector<8x512xf32>
    %191 = arith.select %188, %186, %190 : vector<8x512xi1>, vector<8x512xf32>
    %cst_64 = arith.constant 1.000000e+00 : f32
    %192 = vector.broadcast %cst_64 : f32 to vector<8x512xf32>
    %193 = arith.addf %192, %191 : vector<8x512xf32>
    %194 = arith.mulf %156, %193 : vector<8x512xf32>
    %195 = arith.truncf %194 : vector<8x512xf32> to vector<8x512xbf16>
    %c0_65 = arith.constant 0 : index
    %c0_66 = arith.constant 0 : index
    %c0_67 = arith.constant 0 : index
    %196 = vector.load %arg11[%c0_65, %c0_66, %c0_67] : memref<1x512x128xbf16, #tpu.memory_space<vmem>>, vector<1x512x128xbf16>
    %197 = vector.shape_cast %196 : vector<1x512x128xbf16> to vector<512x128xbf16>
    %cst_68 = arith.constant dense<0.000000e+00> : vector<8x128xf32>
    %198 = tpu.matmul %195, %197, %cst_68 {dimension_numbers = #tpu.dot_dimension_numbers<[1], [0], [0], [1], [0, 0, 1, 1], [], []>} : vector<8x512xbf16>, vector<512x128xbf16>, vector<8x128xf32> -> vector<8x128xf32>
    %199 = vector.broadcast %11 : vector<1x128xf32> to vector<8x128xf32>
    %200 = arith.addf %198, %199 : vector<8x128xf32>
    %201 = arith.addf %124, %200 : vector<8x128xf32>
    %c1_i32 = arith.constant 1 : i32
    %202 = arith.cmpi ne, %arg1, %c1_i32 : i32
    %203 = arith.extui %202 : i1 to i32
    %c0_i32_69 = arith.constant 0 : i32
    %204 = arith.cmpi ne, %203, %c0_i32_69 : i32
    scf.if %204 {
      %c0_72 = arith.constant 0 : index
      %c0_73 = arith.constant 0 : index
      %208 = vector.load %arg13[%c0_72, %c0_73] : memref<8x128xf32, #tpu.memory_space<vmem>>, vector<8x128xf32>
      tpu.vector_store %arg13[%c0_72, %c0_73], %201 {strides = array<i32>} : memref<8x128xf32, #tpu.memory_space<vmem>>, vector<8x128xf32>,
    } else {
    }
    %c1_i32_70 = arith.constant 1 : i32
    %205 = arith.cmpi eq, %arg1, %c1_i32_70 : i32
    %206 = arith.extui %205 : i1 to i32
    %c0_i32_71 = arith.constant 0 : i32
    %207 = arith.cmpi ne, %206, %c0_i32_71 : i32
    scf.if %207 {
      %c0_72 = arith.constant 0 : index
      %c0_73 = arith.constant 0 : index
      %208 = vector.load %arg12[%c0_72, %c0_73] : memref<2x128xf32, #tpu.memory_space<vmem>>, vector<2x128xf32>
      %209 = vector.extract_strided_slice %208 {offsets = [0, 0], sizes = [1, 128], strides = [1, 1]} : vector<2x128xf32> to vector<1x128xf32>
      %210 = vector.extract_strided_slice %208 {offsets = [1, 0], sizes = [1, 128], strides = [1, 1]} : vector<2x128xf32> to vector<1x128xf32>
      %cst_74 = arith.constant dense<0.000000e+00> : vector<8xf32>
      %211 = vector.multi_reduction <add>, %201, %cst_74 [1] : vector<8x128xf32> to vector<8xf32>
      %212 = vector.shape_cast %211 : vector<8xf32> to vector<8x1xf32>
      %cst_75 = arith.constant 1.280000e+02 : f32
      %213 = vector.broadcast %cst_75 : f32 to vector<8x1xf32>
      %214 = arith.divf %212, %213 : vector<8x1xf32>
      %215 = vector.broadcast %214 : vector<8x1xf32> to vector<8x128xf32>
      %216 = arith.subf %201, %215 : vector<8x128xf32>
      %217 = arith.mulf %216, %216 : vector<8x128xf32>
      %cst_76 = arith.constant dense<0.000000e+00> : vector<8xf32>
      %218 = vector.multi_reduction <add>, %217, %cst_76 [1] : vector<8x128xf32> to vector<8xf32>
      %219 = vector.shape_cast %218 : vector<8xf32> to vector<8x1xf32>
      %cst_77 = arith.constant 1.280000e+02 : f32
      %220 = vector.broadcast %cst_77 : f32 to vector<8x1xf32>
      %221 = arith.divf %219, %220 : vector<8x1xf32>
      %222 = vector.broadcast %214 : vector<8x1xf32> to vector<8x128xf32>
      %223 = arith.subf %201, %222 : vector<8x128xf32>
      %cst_78 = arith.constant 9.99999997E-7 : f32
      %224 = vector.broadcast %cst_78 : f32 to vector<8x1xf32>
      %225 = arith.addf %221, %224 : vector<8x1xf32>
      %226 = math.rsqrt %225 : vector<8x1xf32>
      %227 = vector.broadcast %226 : vector<8x1xf32> to vector<8x128xf32>
      %228 = arith.mulf %223, %227 : vector<8x128xf32>
      %229 = vector.broadcast %209 : vector<1x128xf32> to vector<8x128xf32>
      %230 = arith.mulf %228, %229 : vector<8x128xf32>
      %231 = vector.broadcast %210 : vector<1x128xf32> to vector<8x128xf32>
      %232 = arith.addf %230, %231 : vector<8x128xf32>
      %c0_79 = arith.constant 0 : index
      %c0_80 = arith.constant 0 : index
      %233 = vector.load %arg13[%c0_79, %c0_80] : memref<8x128xf32, #tpu.memory_space<vmem>>, vector<8x128xf32>
      tpu.vector_store %arg13[%c0_79, %c0_80], %232 {strides = array<i32>} : memref<8x128xf32, #tpu.memory_space<vmem>>, vector<8x128xf32>,
    } else {
    }
    return
  }
  func.func @transform_0(%arg0: i32, %arg1: i32) -> (i32, i32) {
    %c0_i32 = arith.constant 0 : i32
    %c0_i32_0 = arith.constant 0 : i32
    return %arg0, %c0_i32 : i32, i32
  }
  func.func @transform_1(%arg0: i32, %arg1: i32) -> (i32, i32) {
    %c0_i32 = arith.constant 0 : i32
    %c0_i32_0 = arith.constant 0 : i32
    %c0_i32_1 = arith.constant 0 : i32
    return %c0_i32, %c0_i32_0 : i32, i32
  }
  func.func @transform_2(%arg0: i32, %arg1: i32) -> (i32, i32) {
    %c0_i32 = arith.constant 0 : i32
    %c0_i32_0 = arith.constant 0 : i32
    %c0_i32_1 = arith.constant 0 : i32
    return %c0_i32, %c0_i32_0 : i32, i32
  }
  func.func @transform_3(%arg0: i32, %arg1: i32) -> (i32, i32, i32) {
    %c0_i32 = arith.constant 0 : i32
    %c0_i32_0 = arith.constant 0 : i32
    %c0_i32_1 = arith.constant 0 : i32
    return %arg1, %c0_i32, %c0_i32_0 : i32, i32, i32
  }
  func.func @transform_4(%arg0: i32, %arg1: i32) -> (i32, i32, i32) {
    %c0_i32 = arith.constant 0 : i32
    %c0_i32_0 = arith.constant 0 : i32
    %c0_i32_1 = arith.constant 0 : i32
    return %arg1, %c0_i32, %c0_i32_0 : i32, i32, i32
  }
  func.func @transform_5(%arg0: i32, %arg1: i32) -> (i32, i32, i32) {
    %c0_i32 = arith.constant 0 : i32
    %c0_i32_0 = arith.constant 0 : i32
    %c0_i32_1 = arith.constant 0 : i32
    return %arg1, %c0_i32, %c0_i32_0 : i32, i32, i32
  }
  func.func @transform_6(%arg0: i32, %arg1: i32) -> (i32, i32, i32) {
    %c0_i32 = arith.constant 0 : i32
    %c0_i32_0 = arith.constant 0 : i32
    %c0_i32_1 = arith.constant 0 : i32
    return %arg1, %c0_i32, %c0_i32_0 : i32, i32, i32
  }
  func.func @transform_7(%arg0: i32, %arg1: i32) -> (i32, i32, i32) {
    %c0_i32 = arith.constant 0 : i32
    %c0_i32_0 = arith.constant 0 : i32
    %c0_i32_1 = arith.constant 0 : i32
    return %arg1, %c0_i32, %c0_i32_0 : i32, i32, i32
  }
  func.func @transform_8(%arg0: i32, %arg1: i32) -> (i32, i32, i32) {
    %c0_i32 = arith.constant 0 : i32
    %c0_i32_0 = arith.constant 0 : i32
    %c0_i32_1 = arith.constant 0 : i32
    return %arg1, %c0_i32, %c0_i32_0 : i32, i32, i32
  }
  func.func @transform_9(%arg0: i32, %arg1: i32) -> (i32, i32, i32) {
    %c0_i32 = arith.constant 0 : i32
    %c0_i32_0 = arith.constant 0 : i32
    %c0_i32_1 = arith.constant 0 : i32
    return %arg1, %c0_i32, %c0_i32_0 : i32, i32, i32
  }
  func.func @transform_10(%arg0: i32, %arg1: i32) -> (i32, i32) {
    %c0_i32 = arith.constant 0 : i32
    %c0_i32_0 = arith.constant 0 : i32
    %c0_i32_1 = arith.constant 0 : i32
    return %c0_i32, %c0_i32_0 : i32, i32
  }
  func.func @transform_11(%arg0: i32, %arg1: i32) -> (i32, i32) {
    %c0_i32 = arith.constant 0 : i32
    %c0_i32_0 = arith.constant 0 : i32
    return %arg0, %c0_i32 : i32, i32
  }
}

</mosaic_0001>

<bundles_post_ra>
// kernel: dinov2_forward.1
= control target key start
LH: loop header
LB: loop body
LE: loop exit
PB: predicated region body
PF: predicated region fallthrough
CT: control target
= control target key end

     0   :  { %s4434_s0 = inlined_call_operand.vmem [shape: bf16[16,640], index: 0, kind: input, shape index: {}]   ;;  %s4435_s1 = inlined_call_operand.hbm [shape: bf16[640,128], index: 1, kind: input, shape index: {}]   ;;  %s4436_s2 = inlined_call_operand.vmem [shape: f32[8,128], index: 2, kind: input, shape index: {}]   ;;  %s4437_s3 = inlined_call_operand.hbm [shape: f32[2,8,128], index: 3, kind: input, shape index: {}]   ;;  %s4438_s4 = inlined_call_operand.hbm [shape: bf16[2,128,384], index: 4, kind: input, shape index: {}]   ;;  %s4439_s5 = inlined_call_operand.vmem [shape: f32[2,1,384], index: 5, kind: input, shape index: {}]   ;;  %s4440_s6 = inlined_call_operand.vmem [shape: bf16[2,128,128], index: 6, kind: input, shape index: {}]   ;;  %s4441_s7 = inlined_call_operand.vmem [shape: bf16[2,128,512], index: 7, kind: input, shape index: {}]   ;;  %s4442_s8 = inlined_call_operand.vmem [shape: f32[2,1,512], index: 8, kind: input, shape index: {}]   ;;  %s4443_s9 = inlined_call_operand.vmem [shape: bf16[2,512,128], index: 9, kind: input, shape index: {}]   ;;  %s4444_s10 = inlined_call_operand.hbm [shape: f32[2,128], index: 10, kind: input, shape index: {}]   ;;  %s4445_s11 = inlined_call_operand.vmem [shape: f32[16,128], index: 11, kind: output, shape index: {}]  }
   0x1   :  { %4453 = sst [smem:[#allocation16_spill]] %s4434_s0 }
   0x2   :  { %4454 = sst [smem:[#allocation17_spill]] %s4435_s1 }
   0x3   :  { %4455 = sst [smem:[#allocation18_spill]] %s4436_s2 }
   0x4   :  { %4456 = sst [smem:[#allocation19_spill]] %s4437_s3 }
   0x5   :  { %4457 = sst [smem:[#allocation20_spill]] %s4438_s4 }
   0x6   :  { %4458 = sst [smem:[#allocation21_spill]] %s4439_s5 }
   0x7   :  { %4459 = sst [smem:[#allocation22_spill]] %s4443_s9 }
   0x8   :  { %4460 = sst [smem:[#allocation23_spill]] %s4444_s10 }
   0x9   :  { %4461 = sst [smem:[#allocation24_spill]] %s4445_s11 }
   0xa   :  { %16 = vsyncpa [#allocation3], 0 }
   0xb   :  { %17 = vsyncpa [#allocation5], 0 }
   0xc   :  { %19 = vsyncpa [#allocation5 + $0x1], 0 }
   0xd   :  { %20 = vsyncpa [#allocation8], 0  ;;  %s3909_s17 = smov 0   ;;  %s3911_s18 = smov 0  }
   0xe   :  { %s3913_s19 = smov 0   ;;  %s3915_s20 = smov 0  }
   0xf   :  { %s3917_s21 = smov 0   ;;  %s3919_s22 = smov 0  }
  0x10   :  { %s3921_s23 = smov 0   ;;  %s3923_s24 = smov 0  }
  0x11 LB: > { %4462 = sst [smem:[#allocation12_spill]] %s3826_s23  ;;  %s35_s25 = sadd.s32 1, %s3822_s22  ;;  %s3830_s24 = sphi %s3923_s24, %s26_s24   ;;  %s3826_s23 = sphi %s3921_s23, %s4490_s23   ;;  %s3822_s22 = sphi %s3919_s22, %s4495_s22   ;;  %s3818_s21 = sphi %s3917_s21, %s4488_s21   ;;  %s3814_s20 = sphi %s3915_s20, %s4494_s20   ;;  %s3810_s19 = sphi %s3913_s19, %s4493_s19   ;;  %s3806_s18 = sphi %s3911_s18, %s4492_s18   ;;  %s3802_s17 = sphi %s3909_s17, %s4491_s17  }
  0x12   : > { %s38_s26 = sadd.s32 1, %s3826_s23  ;;  %p36_p0 = scmp.ge.s32.totalorder %s35_s25, 2 }
  0x13   : > { %s113_s27 = sadd.s32 1, %s3810_s19  ;;  %p120_p1 = scmp.ne.s32.totalorder %s3810_s19, %s3806_s18 }
  0x14   : > { %p121_p2 = scmp.eq.s32.totalorder %s3830_s24, 0  ;;  %s4497_s25 = smov (%p36_p0, %s35_s25), 0 }
  0x15   : > { %4463 = sst [smem:[#allocation13_spill]] %s4497_s25  ;;  %s4499_s26 = smov (!%p36_p0, %s38_s26), %s3826_s23 }
  0x16   : > { %s110_s28 = ssub.s32 %s3822_s22, %s4497_s25  ;;  %p3960_p3 = por %p121_p2, %p120_p1 }
  0x17   : > { %p40_p4 = scmp.ge.s32.totalorder %s4499_s26, 2  ;;  %p111_p5 = scmp.eq.s32.totalorder %s110_s28, 0 }
  0x18   : > { %p3362_p6 = scmp.lt.s32.totalorder %s3830_s24, 4  ;;  %s388_s12 = sand.u32 1, %s3830_s24  }
  0x19   : > { %s4501_s26 = smov (%p40_p4, %s4499_s26), 0  ;;  %s390_s13 = sand.u32 1, %s3810_s19  }
  0x1a   : > { %4465 = sst [smem:[#allocation14_spill]] %s4501_s26  ;;  %s2917_s14 = sshll.u32 %s390_s13, 3 }
  0x1b   : > { %s3968_s30 = scalar_select %p111_p5, %s3810_s19, %s113_s27  }
  0x1c   : > { %s2918_s15 = sshll.u32 %s3822_s22, 7  ;;  %s4467_s3 = sld [smem:[#allocation19_spill]] }
  0x1d   : > { %4466 = sst [smem:[#allocation15_spill]] %s3968_s30  ;;  %s392_s2 = scalar_lea.vmem [#allocation4], %s2917_s14 }
  0x1e   : > { %s399_s11 = sshll.u32 %s392_s2, 4  ;;  %p3978_p7 = pnand %p3362_p6, %p3960_p3  ;;  %s400_s11 = int_to_ptr.vmem [resolvable:$true] %s399_s11 }
  0x1f   : > { %s3329_s27 = smul.u32 192, %s390_s13  ;;  %s3983_s26 = scalar_lea.sflag [#allocation5], %s388_s12 }
  0x20   : > { %s3330_s28 = smul.u32 3072, %s3822_s22  ;;  %p4449_p8 = pneg %p3978_p7 }
  0x21   : > { %s3661_s30 = scalar_lea.vmem %s400_s11, 128  ;;  %s3832_s2 = smov [#allocation4]  }
  0x22   : > { %s397_s25 = scalar_lea.hbm %s4467_s3, %s2918_s15  ;;  %p3662_p9 = scmp.ne.s32.totalorder %s400_s11, %s3661_s30 }
  0x23   : > { %s3666_s23 = sshll.u32 %s3832_s2, 4  ;;  %s3667_s23 = int_to_ptr.vmem [resolvable:$false] %s3666_s23 }
  0x24   : > { %p3664_p10 = pnand %p3662_p9, %p4449_p8  ;;  %s3668_s29 = scalar_lea.vmem %s3667_s23, 256 }
  0x25   : > { %p3669_p12 = scmp.lt.s32.totalorder %s400_s11, %s3667_s23  ;;  %p3670_p13 = scmp.lt.s32.totalorder %s3668_s29, %s3661_s30 }
  0x26   : > { %p3665_p11 = pneg %p3664_p10 }
  0x27   : > { %p3671_p0 = por %p3670_p13, %p3669_p12 }
  0x29   : > { %p3672_p1 = pnand %p3671_p0, %p3665_p11 }
  0x2b   : > { %3675 = shalt.err (!%p3672_p1)
}
  0x2c   : > { %3356 = dma.hbm_to_vmem [thread:$0]  (!%p3978_p7), %s397_s25, 128, %s400_s11, %s3983_s26  }
  0x2d   : > { %s410_s12 = scalar_lea.vmem [#allocation6], %s3329_s27  ;;  %s4448_s14 = sadd.s32 4294967295, %s3830_s24  }
  0x2e   : > { %s417_s13 = sshll.u32 %s410_s12, 4  ;;  %p126_p2 = scmp.ne.s32.totalorder %s3806_s18, %s3802_s17  ;;  %s3993_s13 = int_to_ptr.vmem [resolvable:$true] %s417_s13 }
  0x2f   : > { %p4000_p3 = scmp.eq.s32.totalorder %s4448_s14, 0  ;;  %p2913_p4 = scmp.ge.s32.totalorder %s3830_s24, 1 }
  0x30   : > { %p340_p5 = scmp.lt.s32.totalorder %s3830_s24, 5  ;;  %s3833_s17 = smov [#allocation2]  }
  0x31   : > { %s4469_s30 = scalar_select %p4000_p3, 1, 0 }
  0x32   : > { %p4008_p6 = por %p4000_p3, %p126_p2  ;;  %p4012_p9 = pnand %p2913_p4, %p340_p5 }
  0x33   : > { %s352_s25 = sshll.u32 %s3833_s17, 4  ;;  %s4472_s4 = sld [smem:[#allocation20_spill]]  ;;  %s353_s25 = int_to_ptr.vmem [resolvable:$true] %s352_s25 }
  0x34   : > { %s4470_s15 = scalar_select %p4008_p6, 1, 0 }
  0x35   : > { %p3346_p10 = pneg %p4012_p9  ;;  %s3834_s29 = smov [#allocation7]  }
  0x36   : > { %s369_s12 = sshll.u32 %s3834_s29, 4  ;;  %s3687_s17 = scalar_lea.vmem %s353_s25, 5120  ;;  %s370_s12 = int_to_ptr.vmem [resolvable:$true] %s369_s12 }
  0x37   : > { %p4027_p11 = pnand %p3346_p10, %p4000_p3  ;;  %p3688_p13 = scmp.ne.s32.totalorder %s353_s25, %s3687_s17 }
  0x38   : > { %p3695_p2 = scmp.lt.s32.totalorder %s353_s25, %s353_s25  ;;  %p3696_p4 = scmp.lt.s32.totalorder %s3687_s17, %s3687_s17 }
  0x39   : > { %s4023_s2 = scalar_lea.hbm %s4472_s4, %s3330_s28  ;;  %p3678_p12 = pneg %p4027_p11 }
  0x3a   : > { %p3697_p5 = por %p3696_p4, %p3695_p2 }
  0x3b   : > { %p3690_p0 = pnand %p3688_p13, %p3678_p12 }
  0x3d   : > { %p3691_p1 = pneg %p3690_p0 }
  0x3f   : > { %p3698_p10 = pnand %p3697_p5, %p3691_p1 }
  0x41   : > { %3701 = shalt.err (!%p3698_p10)
}
  0x42   : > { %s3835_s28 = smov 64   ;;  %s3836_s16 = smov 4  }
  0x43   : > { %s4474_s1 = sld [smem:[#allocation17_spill]]  ;;  %s3713_s14 = scalar_lea.vmem %s370_s12, 32 }
  0x44   : > { %p3714_p8 = scmp.ne.s32.totalorder %s370_s12, %s3713_s14  ;;  %p3721_p6 = scmp.lt.s32.totalorder %s370_s12, %s370_s12 }
  0x45   : > { %p3722_p3 = scmp.lt.s32.totalorder %s3713_s14, %s3713_s14 }
  0x46   : > { %p3716_p13 = pnand %p3714_p8, %p3678_p12 }
  0x47   : > { %p3723_p2 = por %p3722_p3, %p3721_p6 }
  0x48   : > { %p3717_p0 = pneg %p3716_p13 }
  0x49   : > { %3349 = dma.hbm_to_vmem [thread:$0]  (!%p4027_p11), %s4474_s1, 5120, %s353_s25, [#allocation3], %s3835_s28, %s3835_s28, %s3836_s16  }
  0x4a   : > { %p3724_p1 = pnand %p3723_p2, %p3717_p0 }
  0x4c   : > { %3727 = shalt.err (!%p3724_p1)
}
  0x4d   : > { %s4475_s10 = sld [smem:[#allocation23_spill]]  ;;  %s3741_s25 = scalar_lea.vmem %s3993_s13, 3072 }
  0x4e   : > { %p3742_p4 = scmp.ne.s32.totalorder %s3993_s13, %s3741_s25  ;;  %p4476_p8 = pneg %p3978_p7 }
  0x4f   : > { %s3837_s14 = smov [#allocation6]  }
  0x50   : > { %p3744_p12 = pnand %p3742_p4, %p4476_p8  ;;  %s3746_s28 = sshll.u32 %s3837_s14, 4  ;;  %s3747_s28 = int_to_ptr.vmem [resolvable:$false] %s3746_s28 }
  0x51   : > { %s3748_s16 = scalar_lea.vmem %s3747_s28, 6144  ;;  %p3749_p3 = scmp.lt.s32.totalorder %s3993_s13, %s3747_s28 }
  0x52   : > { %p3745_p5 = pneg %p3744_p12  ;;  %p3750_p6 = scmp.lt.s32.totalorder %s3748_s16, %s3741_s25 }
  0x53   : > { %3352 = dma.hbm_to_vmem [thread:$0]  (!%p4027_p11), %s4475_s10, 32, %s370_s12, [#allocation8]  }
  0x54   : > { %p3751_p10 = por %p3750_p6, %p3749_p3 }
  0x56   : > { %p3752_p13 = pnand %p3751_p10, %p3745_p5 }
  0x58   : > { %3755 = shalt.err (!%p3752_p13)
}
  0x59   : > { %s3838_s3 = smov 192   ;;  %s3839_s23 = smov 12  }
  0x5a   : > { %3359 = dma.hbm_to_vmem [thread:$0]  (!%p3978_p7), %s4023_s2, 3072, %s3993_s13, %s3983_s26, %s3838_s3, %s3838_s3, %s3839_s23  }
  0x5b   : > { %467 = sbr.rel (%p4012_p9) target bundleno = 3533 (0xdcd), region = 64  ;;  %p4477_p11 = scmp.ne.s32.totalorder (!%p4012_p9), %s4469_s30, 0 }
  0x60   : > { %3789 = dma.done.wait (%p4477_p11), [#allocation3], 5120  }
  0x61   : > { %3791 = vsyncadd (%p4477_p11), [#allocation3], 4294962176  ;;  %s4478_s12 = sadd.s32 4294967295, %s3830_s24   ;;  %s475_s29 = sand.u32 1, %s3806_s18  }
  0x62   : > { %s473_s27 = sand.u32 1, %s4478_s12   ;;  %s4069_s17 = sshll.u32 %s475_s29, 3 }
  0x63   : > { %s474_s9 = scalar_lea.sflag [#allocation5], %s473_s27  ;;  %p4479_p7 = scmp.ne.s32.totalorder %s4470_s15, 0 }
  0x65   : > { %3793 = dma.done.wait (%p4479_p7), %s474_s9, 3200  }
  0x66   : > { %3795 = vsyncadd (%p4479_p7), %s474_s9, 4294964096  ;;  %s3331_s13 = smul.u32 192, %s475_s29 }
  0x68   : > { %s4076_s11 = scalar_lea.vmem [#allocation6], %s3331_s13 }
  0x69   : > { %3797 = dma.done.wait (%p4477_p11), [#allocation8], 32  }
  0x6a   : > { %3799 = vsyncadd (%p4477_p11), [#allocation8], 4294967264  ;;  %p561_p9 = scmp.lt.s32.totalorder %s3818_s21, 1  ;;  %p566_p0 = scmp.lt.s32.totalorder %s3814_s20, 1 }
  0x6b   : > { %s4480_s0 = sld [smem:[#allocation16_spill]]  ;;  %p2933_p2 = scmp.ne.s32.totalorder %s3814_s20, 0 }
  0x6c   : > { %s4503_s21 = smov (!%p561_p9, %s3818_s21), 1  ;;  %s4481_s5 = sld [smem:[#allocation21_spill]] }
  0x6d   : > { %s567_s2 = scalar_select %p566_p0, %s3814_s20, 1 }
  0x6e   : > { %s3332_s25 = smul.u32 20, %s4503_s21  ;;  %s2932_s15 = sshll.u32 %s4503_s21, 3 }
  0x6f   : > { %s3333_s14 = smul.u32 3, %s567_s2  ;;  %s3087_s28 = sshll.u32 %s567_s2, 6 }
  0x70   : > { %s4094_s27 = scalar_lea.vmem %s4440_s6, %s3087_s28  ;;  %s3088_s26 = sshll.u32 %s567_s2, 8 }
  0x71   : > { %s4089_s23 = scalar_lea.vmem %s4480_s0, %s3332_s25  ;;  %s4104_s4 = scalar_lea.vmem %s4441_s7, %s3088_s26 }
  0x72   : > { %s4099_s13 = scalar_lea.vmem %s4481_s5, %s3333_s14  ;;  %s2929_s10 = sshll.u32 %s567_s2, 2 }
  0x73   : > { %s4109_s3 = scalar_lea.vmem %s4442_s8, %s2929_s10  ;;  %s4482_s30 = sld [smem:[#allocation22_spill]] }
  0x74   : > { %s4483_s9 = sld [smem:[#allocation24_spill]] }
  0x76   : > { %597 = sbr.rel (%p2933_p2) target bundleno = 387 (0x183), region = 84 }
  0x79   : > { %s4114_s0 = scalar_lea.vmem %s4482_s30, %s3088_s26  ;;  %s4484_s26 = sld [smem:[#allocation18_spill]] (!%p2933_p2) }
  0x7a   : > { %s4119_s5 = scalar_lea.vmem %s4483_s9, %s2932_s15 }
  0x7b   : > { %v3444_v0 = vld [vmem:[#allocation2 + $0x78] sm:$0xff]   ;;  %v3448_v4 = vld [vmem:[#allocation2 + $0x70] sm:$0xff]   ;;  %v3452_v8 = vld [vmem:[#allocation2 + $0x68] sm:$0xff]   ;;  %v3840_v35 = vmov 0.0   ;;  %vm3841_vm0 = vmmov 0  }
  0x7c   : > { %v3445_v1 = vld [vmem:[#allocation2 + $0x38] sm:$0xff]   ;;  %3090 = vmatprep.subr.bf16.mxu0 %v3444_v0  ;;  %v3449_v5 = vld [vmem:[#allocation2 + $0x30] sm:$0xff]   ;;  %v3453_v9 = vld [vmem:[#allocation2 + $0x28] sm:$0xff]  }
  0x7d   : > { %v3446_v2 = vld [vmem:[#allocation2 + $0xf8] sm:$0xff]   ;;  %3091 = vmatpush3.bf16.msra.mxu0 %v3445_v1  ;;  %v3450_v6 = vld [vmem:[#allocation2 + $0xf0] sm:$0xff]   ;;  %v3454_v10 = vld [vmem:[#allocation2 + $0xe8] sm:$0xff]  }
  0x7e   : > { %v3447_v3 = vld [vmem:[#allocation2 + $0xb8] sm:$0xff]   ;;  %3112 = vmatprep.subr.bf16.mxu1 %v3446_v2  ;;  %3092 = vmatprep.subr.bf16.mxu0 %v3448_v4  ;;  %v3451_v7 = vld [vmem:[#allocation2 + $0xb0] sm:$0xff]   ;;  %v3455_v11 = vld [vmem:[#allocation2 + $0xa8] sm:$0xff]  }
  0x7f   : > { %3113 = vmatpush3.bf16.msra.mxu1 %v3447_v3  ;;  %v3456_v12 = vld [vmem:[#allocation2 + $0x60] sm:$0xff]   ;;  %v3460_v16 = vld [vmem:[#allocation2 + $0x58] sm:$0xff]   ;;  %v3464_v20 = vld [vmem:[#allocation2 + $0x50] sm:$0xff]  }
  0x80   : > { %3114 = vmatprep.subr.bf16.mxu1 %v3450_v6  ;;  %v3457_v13 = vld [vmem:[#allocation2 + $0x20] sm:$0xff]   ;;  %v3461_v17 = vld [vmem:[#allocation2 + $0x18] sm:$0xff]   ;;  %v3465_v21 = vld [vmem:[#allocation2 + $0x10] sm:$0xff]  }
  0x81   : > { %3093 = vmatpush3.bf16.msra.mxu0 %v3449_v5  ;;  %v3458_v14 = vld [vmem:[#allocation2 + $0xe0] sm:$0xff]   ;;  %v3462_v18 = vld [vmem:[#allocation2 + $0xd8] sm:$0xff]   ;;  %v3466_v22 = vld [vmem:[#allocation2 + $0xd0] sm:$0xff]  }
  0x82   : > { %3094 = vmatprep.subr.bf16.mxu0 %v3452_v8  ;;  %v3459_v15 = vld [vmem:[#allocation2 + $0xa0] sm:$0xff]   ;;  %v3463_v19 = vld [vmem:[#allocation2 + $0x98] sm:$0xff]   ;;  %v3467_v23 = vld [vmem:[#allocation2 + $0x90] sm:$0xff]  }
  0x83   : > { %3115 = vmatpush3.bf16.msra.mxu1 %v3451_v7  ;;  %v3468_v24 = vld [vmem:[#allocation2 + $0x48] sm:$0xff]   ;;  %v3472_v28 = vld [vmem:[#allocation2 + $0x40] sm:$0xff]   ;;  %v3480_v39 = vld [vmem:[#allocation2 + $0x138] sm:$0xff]  }
  0x84   : > { %3116 = vmatprep.subr.bf16.mxu1 %v3454_v10  ;;  %v3469_v25 = vld [vmem:[#allocation2 + $0x8] sm:$0xff]   ;;  %v3473_v29 = vld [vmem:[#allocation2] sm:$0xff]   ;;  %v3481_v40 = vld [vmem:[#allocation2 + $0x130] sm:$0xff]  }
  0x85   : > { %3095 = vmatpush3.bf16.msra.mxu0 %v3453_v9  ;;  %v3470_v26 = vld [vmem:[#allocation2 + $0xc8] sm:$0xff]   ;;  %v3474_v30 = vld [vmem:[#allocation2 + $0xc0] sm:$0xff]   ;;  %v3484_v43 = vld [vmem:[#allocation2 + $0x118] sm:$0xff]  }
  0x86   : > { %3096 = vmatprep.subr.bf16.mxu0 %v3456_v12  ;;  %v3471_v27 = vld [vmem:[#allocation2 + $0x88] sm:$0xff]   ;;  %v598_v31 = vld [vmem:[%s4089_s23] sm:$0xff]  ;;  %v3485_v44 = vld [vmem:[#allocation2 + $0x110] sm:$0xff]  }
  0x87   : > { %3117 = vmatpush3.bf16.msra.mxu1 %v3455_v11  ;;  %v2934_v32 = vcombine.low %v598_v31, %v598_v31  ;;  %v2935_v33 = vcombine.high %v598_v31, %v598_v31  ;;  %v3477_v34 = vld [vmem:[#allocation2 + $0x80] sm:$0xff]   ;;  %v599_v36 = vld [vmem:[%s4089_s23 + $0x8] sm:$0xff]  ;;  %v3488_v47 = vld [vmem:[%s4089_s23 + $0x10] ss:$0 sps:$4 sm:$0xff]  }
  0x88   : > { %3118 = vmatprep.subr.bf16.mxu1 %v3458_v14  ;;  %v2936_v37 = vcombine.low %v599_v36, %v599_v36  ;;  %v2937_v38 = vcombine.high %v599_v36, %v599_v36  ;;  %v3482_v41 = vld [vmem:[#allocation2 + $0x128] sm:$0xff]   ;;  %v3483_v42 = vld [vmem:[#allocation2 + $0x120] sm:$0xff]  }
  0x89   : > { %3097 = vmatpush3.bf16.msra.mxu0 %v3457_v13  ;;  %972 = vmatprep.mubr.bf16.mxu0 %v2935_v33  ;;  %v3486_v45 = vld [vmem:[#allocation2 + $0x108] sm:$0xff]   ;;  %v3487_v46 = vld [vmem:[#allocation2 + $0x100] sm:$0xff]  }
  0x8a   : > { %3098 = vmatprep.subr.bf16.mxu0 %v3460_v16  ;;  %1012 = vmatprep.mubr.bf16.mxu1 %v2937_v38  ;;  %v681_v57 = vld [vmem:[%s4484_s26] sm:$0xff] }
  0x8b   : > { %3119 = vmatpush3.bf16.msra.mxu1 %v3459_v15 }
  0x8c   : > { %3120 = vmatprep.subr.bf16.mxu1 %v3462_v18 }
  0x8d   : > { %3099 = vmatpush3.bf16.msra.mxu0 %v3461_v17 }
  0x8e   : > { %3100 = vmatprep.subr.bf16.mxu0 %v3464_v20 }
  0x8f   : > { %3121 = vmatpush3.bf16.msra.mxu1 %v3463_v19 }
  0x90   : > { %3122 = vmatprep.subr.bf16.mxu1 %v3466_v22 }
  0x91   : > { %3101 = vmatpush3.bf16.msra.mxu0 %v3465_v21 }
  0x92   : > { %3102 = vmatprep.subr.bf16.mxu0 %v3468_v24 }
  0x93   : > { %3123 = vmatpush3.bf16.msra.mxu1 %v3467_v23 }
  0x94   : > { %3124 = vmatprep.subr.bf16.mxu1 %v3470_v26 }
  0x95   : > { %3103 = vmatpush3.bf16.msra.mxu0 %v3469_v25 }
  0x96   : > { %3104 = vmatprep.subr.bf16.mxu0 %v3472_v28 }
  0x97   : > { %3125 = vmatpush3.bf16.msra.mxu1 %v3471_v27 }
  0x98   : > { %3126 = vmatprep.subr.bf16.mxu1 %v3474_v30 }
  0x99   : > { %3105 = vmatpush3.bf16.msra.mxu0 %v3473_v29 }
  0x9a   : > { %3221 = vmatprep.subr.bf16.mxu0 %v3840_v35 }
  0x9b   : > { %3127 = vmatpush3.bf16.msra.mxu1 %v3477_v34 }
  0x9c   : > { %973 = vmatmul.mubr.bf16.vlgmr.msra.gmra.mxu0 %v2934_v32 }
  0x9d   : > { %3222 = vmatpush3.bf16.msra.mxu0 %v3480_v39  ;;  %3237 = vmatprep.mubr.msk.bf16.mxu0 %vm3841_vm0, %v3840_v35 }
  0x9e   : > { %1013 = vmatmul.mubr.bf16.vlgmr.msra.gmra.mxu1 %v2936_v37  ;;  %3223 = vmatprep.subr.bf16.mxu0 %v3840_v35 }
  0xa1   : > { %3224 = vmatpush3.bf16.msra.mxu0 %v3481_v40 }
  0xa2   : > { %3225 = vmatprep.subr.bf16.mxu0 %v3840_v35 }
  0xa5   : > { %3226 = vmatpush3.bf16.msra.mxu0 %v3482_v41 }
  0xa6   : > { %3227 = vmatprep.subr.bf16.mxu0 %v3840_v35 }
  0xa9   : > { %3228 = vmatpush3.bf16.msra.mxu0 %v3483_v42 }
  0xaa   : > { %3229 = vmatprep.subr.bf16.mxu0 %v3840_v35 }
  0xad   : > { %3230 = vmatpush3.bf16.msra.mxu0 %v3484_v43 }
  0xae   : > { %3231 = vmatprep.subr.bf16.mxu0 %v3840_v35 }
  0xb1   : > { %3232 = vmatpush3.bf16.msra.mxu0 %v3485_v44 }
  0xb2   : > { %3233 = vmatprep.subr.bf16.mxu0 %v3840_v35 }
  0xb5   : > { %3234 = vmatpush3.bf16.msra.mxu0 %v3486_v45 }
  0xb6   : > { %3235 = vmatprep.subr.bf16.mxu0 %v3840_v35 }
  0xb9   : > { %3236 = vmatpush3.bf16.msra.mxu0 %v3487_v46 }
  0xbc   : > { %3238 = vmatmul.mubr.bf16.vlgmr.msra.gmra.mxu0 %v3488_v47 }
 0x15c   : > { %v3106_v48 = vpop.f32.mrf.mxu0 }
 0x15e   : > { %v3107_v49 = vpop.f32.mrf.mxu0  ;;  %v3128_v50 = vpop.f32.mrf.mxu1 }
 0x15f   : > { %v3108_v56 = vadd.f32 %v3107_v49, %v3106_v48 }
 0x160   : > { %v3109_v51 = vpop.f32.mrf.mxu0  ;;  %v3129_v52 = vpop.f32.mrf.mxu1 }
 0x161   : > { %v975_v58 = vadd.f32 %v3108_v56, %v681_v57  ;;  %v3130_v59 = vadd.f32 %v3129_v52, %v3128_v50 }
 0x162   : > { %v3110_v53 = vpop.f32.mrf.mxu0  ;;  %v3131_v54 = vpop.f32.mrf.mxu1 }
 0x163   : > { %v1015_v60 = vadd.f32 %v3130_v59, %v975_v58 }
 0x164   : > { %v3132_v55 = vpop.f32.mrf.mxu1 }
 0x17c   : > { %v1054_v61 = vpop.f32.mrf.mxu0 }
 0x17d   : > { %v1055_v62 = vadd.f32 %v1054_v61, %v1015_v60 }
 0x17e   : > { %v3239_v63 = vpop.f32.mrf.mxu0 }
 0x17f   : > { %1060 = vst [vmem:[%s4119_s5] sm:$0xff] %v1055_v62 }
 0x180   : > { %v1057_v0 = vpop.f32.mrf.mxu0 }
 0x182   : > { %v3240_v1 = vpop.f32.mrf.mxu0 }
 0x183 PF: > { %v3489_v3 = vld [vmem:[%s4076_s11 + $0xac] ss:$12 sps:$4 sm:$0xff]   ;;  %v3491_v4 = vld [vmem:[%s4076_s11 + $0xa8] ss:$12 sps:$4 sm:$0xff]   ;;  %v3842_v5 = vmov 0.0   ;;  %v3843_v24 = vmov 0   ;;  %v1063_v36 = vlaneseq }
 0x184   : > { %3241 = vmatprep.subr.bf16.mxu1 %v3842_v5  ;;  %v3492_v6 = vld [vmem:[%s4076_s11 + $0xb0] ss:$12 sps:$4 sm:$0xff]   ;;  %v3493_v7 = vld [vmem:[%s4076_s11 + $0x94] ss:$12 sps:$4 sm:$0xff]   ;;  %1267 = vmatprep.subr.bf16.mxu0 %v3489_v3  ;;  %v3496_v9 = vld [vmem:[%s4076_s11 + $0x98] ss:$12 sps:$4 sm:$0xff]  }
 0x185   : > { %v3495_v8 = vld [vmem:[%s4076_s11 + $0x90] ss:$12 sps:$4 sm:$0xff]   ;;  %1268 = vmatpush1.bf16.msra.mxu0 %v3491_v4  ;;  %3242 = vmatpush3.bf16.msra.mxu1 %v3492_v6  ;;  %v3499_v15 = vld [vmem:[%s4076_s11 + $0x78] ss:$12 sps:$4 sm:$0xff]   ;;  %v3500_v16 = vld [vmem:[%s4076_s11 + $0x80] ss:$12 sps:$4 sm:$0xff]  }
 0x186   : > { %v4130_v2 = vld [vmem:[%s4119_s5] sm:$0xff]  ;;  %1269 = vmatprep.subr.bf16.mxu0 %v3493_v7  ;;  %3243 = vmatprep.subr.bf16.mxu1 %v3842_v5  ;;  %v3497_v14 = vld [vmem:[%s4076_s11 + $0x7c] ss:$12 sps:$4 sm:$0xff]   ;;  %v3503_v18 = vld [vmem:[%s4076_s11 + $0x60] ss:$12 sps:$4 sm:$0xff]   ;;  %vm3844_vm1 = vmmov 0  }
 0x187   : > { %1067 = vadd.xlane.f32.xlu0 %v4130_v2  ;;  %v3501_v17 = vld [vmem:[%s4076_s11 + $0x64] ss:$12 sps:$4 sm:$0xff]   ;;  %v3504_v19 = vld [vmem:[%s4076_s11 + $0x68] ss:$12 sps:$4 sm:$0xff]   ;;  %v3505_v20 = vld [vmem:[%s4076_s11 + $0x4c] ss:$12 sps:$4 sm:$0xff]   ;;  %1299 = vmatprep.mubr.bf16.mxu0 %v3843_v24 }
 0x188   : > { %v3507_v21 = vld [vmem:[%s4076_s11 + $0x48] ss:$12 sps:$4 sm:$0xff]   ;;  %v3508_v22 = vld [vmem:[%s4076_s11 + $0x50] ss:$12 sps:$4 sm:$0xff]   ;;  %3257 = vmatprep.mubr.msk.bf16.mxu1 %vm3844_vm1, %v3842_v5  ;;  %v3512_v26 = vld [vmem:[%s4076_s11 + $0x38] ss:$12 sps:$4 sm:$0xff]  }
 0x189   : > { %1270 = vmatpush1.bf16.msra.mxu0 %v3495_v8  ;;  %3244 = vmatpush3.bf16.msra.mxu1 %v3496_v9  ;;  %v3509_v23 = vld [vmem:[%s4076_s11 + $0x34] ss:$12 sps:$4 sm:$0xff]   ;;  %v3511_v25 = vld [vmem:[%s4076_s11 + $0x30] ss:$12 sps:$4 sm:$0xff]   ;;  %v3515_v28 = vld [vmem:[%s4076_s11 + $0x18] ss:$12 sps:$4 sm:$0xff]  }
 0x18a   : > { %3245 = vmatprep.subr.bf16.mxu1 %v3842_v5  ;;  %1271 = vmatprep.subr.bf16.mxu0 %v3497_v14  ;;  %v3513_v27 = vld [vmem:[%s4076_s11 + $0x1c] ss:$12 sps:$4 sm:$0xff]   ;;  %v3516_v29 = vld [vmem:[%s4076_s11 + $0x20] ss:$12 sps:$4 sm:$0xff]   ;;  %v3517_v30 = vld [vmem:[%s4076_s11 + $0x4] ss:$12 sps:$4 sm:$0xff]  }
 0x18b   : > { %v3519_v31 = vld [vmem:[%s4076_s11] ss:$12 sps:$4 sm:$0xff]   ;;  %v3520_v32 = vld [vmem:[%s4076_s11 + $0x8] ss:$12 sps:$4 sm:$0xff]   ;;  %v4171_v37 = vshrl.u32 %v1063_v36, 7  ;;  %s4485_s11 = scalar_lea.vmem [#allocation4], %s4069_s17 }
 0x18c   : > { %v4178_v39 = vld [vmem:[%s4485_s11] sm:$0xff]  ;;  %vm1351_vm2 = vcmask 261120   ;;  %s3845_s2 = smov 96   ;;  %s3846_s15 = smov 32   ;;  %vm1414_vm3 = vcmask 1043456   ;;  %v1064_v7 = vand.u32 127, %v1063_v36 }
 0x18d   : > { %1272 = vmatpush1.bf16.msra.mxu0 %v3499_v15  ;;  %3246 = vmatpush3.bf16.msra.mxu1 %v3500_v16  ;;  %v4174_v38 = vsub.s32 0, %v4171_v37  ;;  %v4181_v40 = vsub.s32 1, %v4171_v37  ;;  %v1122_v48 = vld [vmem:[%s4099_s13] sm:$0x7]  ;;  %v4193_v49 = vsub.s32 2, %v4171_v37  ;;  %vm1398_vm5 = vcmask 64512  }
 0x18e   : > { %3247 = vmatprep.subr.bf16.mxu1 %v3842_v5  ;;  %1273 = vmatprep.subr.bf16.mxu0 %v3501_v17  ;;  %vm1065_vm4 = vcmp.lt.s32.totalorder %v1064_v7, 5  ;;  %v3847_v8 = vmov -1e+30   ;;  %s3848_s23 = smov 64   ;;  %vm1804_vm6 = vcmask 523264   ;;  %vm1806_vm7 = vcmask 785408  }
 0x18f   : > { %v1082_v41 = vrot.slane %v4178_v39, %v4174_v38  ;;  %v1087_v44 = vrot.slane %v4178_v39, %v4181_v40  ;;  %v1131_v50 = vrot.slane %v1122_v48, %v4181_v40  ;;  %v1135_v55 = vrot.slane %v1122_v48, %v4193_v49  ;;  %p3083_p1 = scmp.eq.s32.totalorder %s3814_s20, 1 }
 0x190   : > { %v1127_v59 = vrot.slane %v1122_v48, %v4174_v38  ;;  %v4210_v9 = vsel %vm1065_vm4, 0.0, %v3847_v8 }
 0x191   : > { %1274 = vmatpush1.bf16.msra.mxu0 %v3503_v18  ;;  %3248 = vmatpush3.bf16.msra.mxu1 %v3504_v19 }
 0x192   : > { %1275 = vmatprep.subr.bf16.mxu0 %v3505_v20  ;;  %3249 = vmatprep.subr.bf16.mxu1 %v3842_v5 }
 0x195   : > { %1276 = vmatpush1.bf16.msra.mxu0 %v3507_v21  ;;  %3250 = vmatpush3.bf16.msra.mxu1 %v3508_v22 }
 0x196   : > { %1277 = vmatprep.subr.bf16.mxu0 %v3509_v23  ;;  %3251 = vmatprep.subr.bf16.mxu1 %v3842_v5 }
 0x199   : > { %1278 = vmatpush1.bf16.msra.mxu0 %v3511_v25  ;;  %3252 = vmatpush3.bf16.msra.mxu1 %v3512_v26 }
 0x19a   : > { %1279 = vmatprep.subr.bf16.mxu0 %v3513_v27  ;;  %3253 = vmatprep.subr.bf16.mxu1 %v3842_v5 }
 0x19d   : > { %1280 = vmatpush1.bf16.msra.mxu0 %v3515_v28  ;;  %3254 = vmatpush3.bf16.msra.mxu1 %v3516_v29 }
 0x19e   : > { %1281 = vmatprep.subr.bf16.mxu0 %v3517_v30  ;;  %3255 = vmatprep.subr.bf16.mxu1 %v3842_v5 }
 0x1a1   : > { %1282 = vmatpush1.bf16.msra.mxu0 %v3519_v31  ;;  %3256 = vmatpush3.bf16.msra.mxu1 %v3520_v32 }
 0x1a2   : > { %3261 = vmatprep.subr.bf16.mxu1 %v3842_v5  ;;  %3285 = vmatprep.subr.bf16.mxu0 %v3842_v5 }
 0x210   : > { %v1068_v10 = vpop.xlane.xlu0 %1067 }
 0x211   : > { %v1070_v11 = vmul.f32 0.0078125, %v1068_v10 }
 0x213   : > { %v1071_v12 = vsub.f32 %v4130_v2, %v1070_v11 }
 0x215   : > { %v1072_v13 = vmul.f32 %v1071_v12, %v1071_v12 }
 0x217   : > { %1073 = vadd.xlane.f32.xlu0 %v1072_v13 }
 0x2a0   : > { %v1074_v33 = vpop.xlane.xlu0 %1073 }
 0x2a1   : > { %v1075_v34 = vmul.f32 0.0078125, %v1074_v33 }
 0x2a3   : > { %v1076_v35 = vadd.f32 1e-06, %v1075_v34 }
 0x2a5   : > { %3609 = vrsqrt.f32 %v1076_v35 }
 0x2b2   : > { %v3610_v42 = vpop.eup %3609 }
 0x2b3   : > { %v1078_v43 = vmul.f32 %v3610_v42, %v1071_v12 }
 0x2b5   : > { %v1083_v45 = vmul.f32 %v1082_v41, %v1078_v43 }
 0x2b7   : > { %v1088_v46 = vadd.f32 %v1087_v44, %v1083_v45 }
 0x2b9   : > { %v1089_v47 = vpack.c.bf16 %v1088_v46, %v1088_v46 }
 0x2bb   : > { %1300 = vmatmul.mubr.bf16.vlgmr.msra.gmra.mxu0 %v1089_v47  ;;  %3258 = vmatmul.mubr.bf16.vlgmr.msra.gmra.mxu1 %v1089_v47 }
 0x2bc   : > { %3263 = vmatprep.mubr.msk.bf16.mxu1 %vm3844_vm1, %v3842_v5  ;;  %3287 = vmatprep.mubr.msk.bf16.mxu0 %vm3844_vm1, %v3842_v5 }
 0x37b   : > { %v1301_v51 = vpop.f32.mrf.mxu0  ;;  %v1342_v52 = vpop.f32.mrf.mxu1 }
 0x37c   : > { %v1343_v63 = vadd.f32 %v1342_v52, %v1135_v55  ;;  %v1302_v1 = vadd.f32 %v1301_v51, %v1127_v59 }
 0x37d   : > { %v1303_v53 = vpop.f32.mrf.mxu0  ;;  %v3259_v54 = vpop.f32.mrf.mxu1 }
 0x37e   : > { %v1304_v56 = vadd.f32 %v1303_v53, %v1131_v50  ;;  %v4201_v3 = vpack.c.bf16 %v1343_v63, %v1343_v63  ;;  %v1348_v4 = vpack.c.bf16 %v1302_v1, %v1302_v1 }
 0x37f   : > { %v1305_v57 = vpop.f32.mrf.mxu0  ;;  %v1345_v58 = vpop.f32.mrf.mxu1 }
 0x380   : > { %v1349_v60 = vpack.c.bf16 %v1304_v56, %v1304_v56  ;;  %v1416_v6 = vsel %vm1414_vm3, %v4201_v3, 0 }
 0x381   : > { %v1306_v61 = vpop.f32.mrf.mxu0  ;;  %v3260_v62 = vpop.f32.mrf.mxu1 }
 0x382   : > { %1462 = vrot.lane.b32.xlu0 %v1349_v60, %s3845_s2  ;;  %v1356_v0 = vsel %vm1351_vm2, %v1349_v60, 0 }
 0x383   : > { %3262 = vmatpush3.bf16.xpose.msra.mxu1 %v1356_v0 }
 0x384   : > { %3267 = vmatprep.subr.bf16.mxu1 %v3842_v5 }
 0x386   : > { %1683 = vrot.lane.b32.xlu0 %v1349_v60, %s3846_s15 }
 0x38a   : > { %3264 = vmatmul.mubr.msk.bf16.vlgmr.msra.gmra.mxu1 %vm1351_vm2, %v1348_v4 }
 0x38b   : > { %3268 = vmatpush3.bf16.msra.mxu1 %v1416_v6  ;;  %3269 = vmatprep.mubr.msk.bf16.mxu1 %vm3844_vm1, %v3842_v5 }
 0x38c   : > { %3273 = vmatprep.subr.bf16.mxu1 %v3842_v5 }
 0x3f4   : > { %v1463_v23 = vpop.permute.xlu0 %1462 }
 0x3f5   : > { %v1468_v33 = vsel %vm1351_vm2, %v1463_v23, 0 }
 0x3f8   : > { %v1684_v28 = vpop.permute.xlu0 %1683 }
 0x3f9   : > { %v1689_v31 = vsel %vm1351_vm2, %v1684_v28, 0 }
 0x44a   : > { %v1392_v10 = vpop.f32.mrf.mxu1 }
 0x44b   : > { %v1393_v11 = vadd.f32 %v1392_v10, %v4210_v9 }
 0x44c   : > { %v3265_v12 = vpop.f32.mrf.mxu1 }
 0x44d   : > { %v1399_v13 = vsel %vm1398_vm5, %v1393_v11, -inf }
 0x44e   : > { %1400 = vmax.xlane.f32.xlu1 %v1399_v13  ;;  %v1395_v14 = vpop.f32.mrf.mxu1 }
 0x450   : > { %v3266_v15 = vpop.f32.mrf.mxu1 }
 0x4d7   : > { %v1401_v16 = vpop.xlane.xlu1 %1400 }
 0x4d8   : > { %v1402_v17 = vsub.f32 %v1393_v11, %v1401_v16 }
 0x4da   : > { %v1403_v18 = vmul.f32 1.442695, %v1402_v17 }
 0x4dc   : > { %3611 = vpow2.f32 %v1403_v18 }
 0x4e9   : > { %v3612_v19 = vpop.eup %3611 }
 0x4ea   : > { %v1405_v20 = vsel %vm1398_vm5, %v3612_v19, 0.0 }
 0x4eb   : > { %1406 = vadd.xlane.f32.xlu1 %v1405_v20 }
 0x4fc   : > { %1459 = vrot.lane.b32.xlu1 %v1348_v4, %s3845_s2 }
 0x500   : > { %1573 = vrot.lane.b32.xlu1 %v1349_v60, %s3848_s23 }
 0x504   : > { %1571 = vrot.lane.b32.xlu1 %v1348_v4, %s3848_s23 }
 0x508   : > { %1681 = vrot.lane.b32.xlu1 %v1348_v4, %s3846_s15 }
 0x574   : > { %v1407_v21 = vpop.xlane.xlu1 %1406 }
 0x575   : > { %3613 = vrcp.f32 %v1407_v21 }
 0x578   : > { %v1460_v22 = vpop.permute.xlu1 %1459 }
 0x57c   : > { %v1574_v25 = vpop.permute.xlu1 %1573 }
 0x57d   : > { %v1579_v26 = vsel %vm1351_vm2, %v1574_v25, 0 }
 0x57e   : > { %3286 = vmatpush3.bf16.xpose.msra.mxu0 %v1579_v26 }
 0x57f   : > { %3297 = vmatprep.subr.bf16.mxu0 %v3842_v5 }
 0x580   : > { %v1572_v30 = vpop.permute.xlu1 %1571 }
 0x582   : > { %v3614_v27 = vpop.eup %3613 }
 0x583   : > { %v1409_v29 = vmul.f32 %v3614_v27, %v3612_v19 }
 0x584   : > { %v1682_v34 = vpop.permute.xlu1 %1681 }
 0x585   : > { %3288 = vmatmul.mubr.msk.bf16.vlgmr.msra.gmra.mxu0 %vm1351_vm2, %v1572_v30  ;;  %v1410_v32 = vpack.c.bf16 %v1409_v29, %v1409_v29 }
 0x586   : > { %3298 = vmatpush3.bf16.xpose.msra.mxu0 %v1689_v31  ;;  %3299 = vmatprep.mubr.msk.bf16.mxu0 %vm3844_vm1, %v3842_v5 }
 0x587   : > { %3270 = vmatmul.mubr.msk.bf16.vlgmr.msra.gmra.mxu1 %vm1398_vm5, %v1410_v32  ;;  %3309 = vmatprep.subr.bf16.mxu0 %v3842_v5 }
 0x588   : > { %3274 = vmatpush3.bf16.xpose.msra.mxu1 %v1468_v33  ;;  %3275 = vmatprep.mubr.msk.bf16.mxu1 %vm3844_vm1, %v3842_v5 }
 0x589   : > { %3279 = vmatprep.subr.bf16.mxu1 %v3842_v5 }
 0x58d   : > { %3300 = vmatmul.mubr.msk.bf16.vlgmr.msra.gmra.mxu0 %vm1351_vm2, %v1682_v34  ;;  %v3521_v34 = vld [vmem:[%s4094_s27 + $0x38] sm:$0xff]  }
 0x58e   : > { %3325 = vmatprep.mubr.msk.bf16.mxu0 %vm3844_vm1, %v3842_v5  ;;  %3310 = vmatpush3.bf16.msra.mxu0 %v3521_v34  ;;  %v3564_v34 = vld [vmem:[%s4104_s4 + $0x4c] ss:$16 sps:$4 sm:$0xff]  }
 0x58f   : > { %3276 = vmatmul.mubr.msk.bf16.vlgmr.msra.gmra.mxu1 %vm1351_vm2, %v1460_v22  ;;  %3311 = vmatprep.subr.bf16.mxu0 %v3842_v5 }
 0x590   : > { %3281 = vmatprep.mubr.msk.bf16.mxu1 %vm3844_vm1, %v3842_v5 }
 0x645   : > { %v1615_v35 = vpop.f32.mrf.mxu0 }
 0x646   : > { %v1616_v36 = vadd.f32 %v1615_v35, %v4210_v9  ;;  %v3522_v35 = vld [vmem:[%s4094_s27 + $0x30] sm:$0xff]  }
 0x647   : > { %v4238_v41 = vpop.f32.mrf.mxu1  ;;  %v3289_v42 = vpop.f32.mrf.mxu0  ;;  %3312 = vmatpush3.bf16.msra.mxu0 %v3522_v35  ;;  %v3559_v35 = vld [vmem:[%s4104_s4 + $0x40] ss:$16 sps:$4 sm:$0xff]  }
 0x648   : > { %v1621_v43 = vsel %vm1398_vm5, %v1616_v36, -inf  ;;  %3313 = vmatprep.subr.bf16.mxu0 %v3842_v5  ;;  %v3524_v42 = vld [vmem:[%s4094_s27 + $0x20] sm:$0xff]  }
 0x649   : > { %1622 = vmax.xlane.f32.xlu1 %v1621_v43  ;;  %v3271_v44 = vpop.f32.mrf.mxu1  ;;  %v1618_v45 = vpop.f32.mrf.mxu0  ;;  %v3525_v43 = vld [vmem:[%s4094_s27 + $0x18] sm:$0xff]  }
 0x64a   : > { %v3526_v44 = vld [vmem:[%s4094_s27 + $0x10] sm:$0xff]   ;;  %v3527_v45 = vld [vmem:[%s4094_s27 + $0x8] sm:$0xff]  }
 0x64b   : > { %v1455_v46 = vpop.f32.mrf.mxu1  ;;  %v3290_v47 = vpop.f32.mrf.mxu0 }
 0x64d   : > { %v3272_v48 = vpop.f32.mrf.mxu1  ;;  %v1725_v50 = vpop.f32.mrf.mxu0 }
 0x64e   : > { %v1726_v56 = vadd.f32 %v1725_v50, %v4210_v9  ;;  %v3528_v48 = vld [vmem:[%s4094_s27] sm:$0xff]  }
 0x64f   : > { %v1504_v51 = vpop.f32.mrf.mxu1  ;;  %v3301_v52 = vpop.f32.mrf.mxu0 }
 0x650   : > { %v1505_v53 = vadd.f32 %v1504_v51, %v4210_v9  ;;  %v1731_v61 = vsel %vm1398_vm5, %v1726_v56, -inf }
 0x651   : > { %v3277_v54 = vpop.f32.mrf.mxu1  ;;  %v1728_v55 = vpop.f32.mrf.mxu0 }
 0x652   : > { %v1510_v57 = vsel %vm1398_vm5, %v1505_v53, -inf }
 0x653   : > { %v3302_v58 = vpop.f32.mrf.mxu0  ;;  %1511 = vmax.xlane.f32.xlu0 %v1510_v57  ;;  %v1507_v59 = vpop.f32.mrf.mxu1 }
 0x655   : > { %v3278_v60 = vpop.f32.mrf.mxu1 }
 0x657   : > { %1732 = vmax.xlane.f32.xlu0 %v1731_v61 }
 0x6d2   : > { %v1623_v62 = vpop.xlane.xlu1 %1622 }
 0x6d3   : > { %v1624_v63 = vsub.f32 %v1616_v36, %v1623_v62  ;;  %v3523_v36 = vld [vmem:[%s4094_s27 + $0x28] sm:$0xff]  }
 0x6d4   : > { %3314 = vmatpush3.bf16.msra.mxu0 %v3523_v36  ;;  %v3562_v36 = vld [vmem:[%s4104_s4 + $0x48] ss:$16 sps:$4 sm:$0xff]  }
 0x6d5   : > { %v1625_v0 = vmul.f32 1.442695, %v1624_v63  ;;  %3315 = vmatprep.subr.bf16.mxu0 %v3842_v5 }
 0x6d7   : > { %3615 = vpow2.f32 %v1625_v0 }
 0x6d8   : > { %3316 = vmatpush3.bf16.msra.mxu0 %v3524_v42  ;;  %v3567_v42 = vld [vmem:[%s4104_s4 + $0x24] ss:$16 sps:$4 sm:$0xff]  }
 0x6d9   : > { %3317 = vmatprep.subr.bf16.mxu0 %v3842_v5 }
 0x6dc   : > { %v1512_v1 = vpop.xlane.xlu0 %1511  ;;  %3318 = vmatpush3.bf16.msra.mxu0 %v3525_v43  ;;  %v3570_v43 = vld [vmem:[%s4104_s4 + $0x2c] ss:$16 sps:$4 sm:$0xff]  }
 0x6dd   : > { %v1513_v4 = vsub.f32 %v1505_v53, %v1512_v1  ;;  %3319 = vmatprep.subr.bf16.mxu0 %v3842_v5 }
 0x6df   : > { %v1514_v6 = vmul.f32 1.442695, %v1513_v4  ;;  %v1828_v4 = vrot.slane %v4178_v39, %v4193_v49 }
 0x6e0   : > { %v1733_v7 = vpop.xlane.xlu0 %1732  ;;  %3320 = vmatpush3.bf16.msra.mxu0 %v3526_v44  ;;  %v3565_v44 = vld [vmem:[%s4104_s4 + $0x20] ss:$16 sps:$4 sm:$0xff]  }
 0x6e1   : > { %3617 = vpow2.f32 %v1514_v6  ;;  %v1734_v8 = vsub.f32 %v1726_v56, %v1733_v7  ;;  %3321 = vmatprep.subr.bf16.mxu0 %v3842_v5 }
 0x6e3   : > { %v1735_v9 = vmul.f32 1.442695, %v1734_v8 }
 0x6e4   : > { %v3616_v10 = vpop.eup %3615  ;;  %3322 = vmatpush3.bf16.msra.mxu0 %v3527_v45  ;;  %v3568_v45 = vld [vmem:[%s4104_s4 + $0x28] ss:$16 sps:$4 sm:$0xff]  }
 0x6e5   : > { %3619 = vpow2.f32 %v1735_v9  ;;  %v1627_v11 = vsel %vm1398_vm5, %v3616_v10, 0.0  ;;  %3323 = vmatprep.subr.bf16.mxu0 %v3842_v5 }
 0x6e6   : > { %1628 = vadd.xlane.f32.xlu0 %v1627_v11  ;;  %v3529_v11 = vld [vmem:[%s4104_s4 + $0xe0] ss:$16 sps:$4 sm:$0xff]  }
 0x6e8   : > { %3324 = vmatpush3.bf16.msra.mxu0 %v3528_v48  ;;  %v3571_v48 = vld [vmem:[%s4104_s4] ss:$16 sps:$4 sm:$0xff]  }
 0x6ee   : > { %v3618_v12 = vpop.eup %3617 }
 0x6ef   : > { %v1516_v13 = vsel %vm1398_vm5, %v3618_v12, 0.0 }
 0x6f0   : > { %1517 = vadd.xlane.f32.xlu0 %v1516_v13  ;;  %v3532_v13 = vld [vmem:[%s4104_s4 + $0xe8] ss:$16 sps:$4 sm:$0xff]  }
 0x6f2   : > { %v3620_v14 = vpop.eup %3619 }
 0x6f3   : > { %v1737_v15 = vsel %vm1398_vm5, %v3620_v14, 0.0 }
 0x6f4   : > { %1738 = vadd.xlane.f32.xlu1 %v1737_v15  ;;  %v3540_v15 = vld [vmem:[%s4104_s4 + $0xcc] ss:$16 sps:$4 sm:$0xff]  }
 0x705   : > { %1633 = vrot.lane.b32.xlu1 %v4201_v3, %s3848_s23 }
 0x706   : > { %1523 = vrot.lane.b32.xlu0 %v4201_v3, %s3845_s2 }
 0x709   : > { %1743 = vrot.lane.b32.xlu1 %v4201_v3, %s3846_s15 }
 0x76f   : > { %v1629_v16 = vpop.xlane.xlu0 %1628 }
 0x779   : > { %v1518_v17 = vpop.xlane.xlu0 %1517 }
 0x77a   : > { %3621 = vrcp.f32 %v1518_v17 }
 0x77b   : > { %3623 = vrcp.f32 %v1629_v16  ;;  %v3538_v16 = vld [vmem:[%s4104_s4 + $0xc8] ss:$16 sps:$4 sm:$0xff]  }
 0x77d   : > { %v1524_v18 = vpop.permute.xlu0 %1523  ;;  %v1739_v20 = vpop.xlane.xlu1 %1738 }
 0x77e   : > { %v1529_v19 = vsel %vm1414_vm3, %v1524_v18, 0  ;;  %3625 = vrcp.f32 %v1739_v20 }
 0x77f   : > { %3280 = vmatpush3.bf16.msra.mxu1 %v1529_v19 }
 0x780   : > { %3291 = vmatprep.subr.bf16.mxu1 %v3842_v5 }
 0x781   : > { %v1634_v23 = vpop.permute.xlu1 %1633 }
 0x782   : > { %v1639_v27 = vsel %vm1414_vm3, %v1634_v23, 0  ;;  %v3541_v23 = vld [vmem:[%s4104_s4 + $0xa0] ss:$16 sps:$4 sm:$0xff]  }
 0x785   : > { %v1744_v28 = vpop.permute.xlu1 %1743 }
 0x786   : > { %v1749_v31 = vsel %vm1414_vm3, %v1744_v28, 0  ;;  %v3552_v28 = vld [vmem:[%s4104_s4 + $0x8c] ss:$16 sps:$4 sm:$0xff]  }
 0x787   : > { %v3622_v21 = vpop.eup %3621 }
 0x788   : > { %v1520_v22 = vmul.f32 %v3622_v21, %v3618_v12  ;;  %v3624_v26 = vpop.eup %3623  ;;  %v3531_v12 = vld [vmem:[%s4104_s4 + $0xe4] ss:$16 sps:$4 sm:$0xff]  }
 0x789   : > { %v1631_v3 = vmul.f32 %v3624_v26, %v3616_v10  ;;  %v3543_v21 = vld [vmem:[%s4104_s4 + $0xa4] ss:$16 sps:$4 sm:$0xff]   ;;  %v3547_v26 = vld [vmem:[%s4104_s4 + $0x80] ss:$16 sps:$4 sm:$0xff]  }
 0x78a   : > { %v1521_v25 = vpack.c.bf16 %v1520_v22, %v1520_v22  ;;  %v3546_v22 = vld [vmem:[%s4104_s4 + $0xac] ss:$16 sps:$4 sm:$0xff]  }
 0x78b   : > { %v1632_v29 = vpack.c.bf16 %v1631_v3, %v1631_v3  ;;  %v3626_v30 = vpop.eup %3625  ;;  %v3550_v3 = vld [vmem:[%s4104_s4 + $0x88] ss:$16 sps:$4 sm:$0xff]  }
 0x78c   : > { %3282 = vmatmul.mubr.msk.bf16.vlgmr.msra.gmra.mxu1 %vm1398_vm5, %v1521_v25  ;;  %v1741_v32 = vmul.f32 %v3626_v30, %v3620_v14  ;;  %v3534_v14 = vld [vmem:[%s4104_s4 + $0xec] ss:$16 sps:$4 sm:$0xff]   ;;  %v3544_v25 = vld [vmem:[%s4104_s4 + $0xa8] ss:$16 sps:$4 sm:$0xff]  }
 0x78d   : > { %3292 = vmatpush3.bf16.msra.mxu1 %v1639_v27  ;;  %3293 = vmatprep.mubr.msk.bf16.mxu1 %vm3844_vm1, %v3842_v5  ;;  %v3549_v27 = vld [vmem:[%s4104_s4 + $0x84] ss:$16 sps:$4 sm:$0xff]   ;;  %v3558_v30 = vld [vmem:[%s4104_s4 + $0x6c] ss:$16 sps:$4 sm:$0xff]  }
 0x78e   : > { %3303 = vmatprep.subr.bf16.mxu1 %v3842_v5  ;;  %v1742_v33 = vpack.c.bf16 %v1741_v32, %v1741_v32  ;;  %2195 = vmatprep.subr.bf16.mxu0 %v3534_v14  ;;  %v3556_v32 = vld [vmem:[%s4104_s4 + $0x68] ss:$16 sps:$4 sm:$0xff]   ;;  %v3591_v14 = vld [vmem:[%s4114_s0 + $0x20] sm:$0xff]  }
 0x794   : > { %3294 = vmatmul.mubr.msk.bf16.vlgmr.msra.gmra.mxu1 %vm1398_vm5, %v1632_v29  ;;  %v3555_v29 = vld [vmem:[%s4104_s4 + $0x64] ss:$16 sps:$4 sm:$0xff]  }
 0x795   : > { %3304 = vmatpush3.bf16.msra.mxu1 %v1749_v31  ;;  %3305 = vmatprep.mubr.msk.bf16.mxu1 %vm3844_vm1, %v3842_v5  ;;  %v3553_v31 = vld [vmem:[%s4104_s4 + $0x60] ss:$16 sps:$4 sm:$0xff]  }
 0x796   : > { %2154 = vmatprep.subr.bf16.mxu1 %v3531_v12  ;;  %v3589_v12 = vld [vmem:[%s4114_s0 + $0x60] sm:$0xff]  }
 0x79c   : > { %3306 = vmatmul.mubr.msk.bf16.vlgmr.msra.gmra.mxu1 %vm1398_vm5, %v1742_v33  ;;  %v3561_v33 = vld [vmem:[%s4104_s4 + $0x44] ss:$16 sps:$4 sm:$0xff]  }
 0x79d   : > { %2186 = vmatprep.mubr.bf16.mxu1 %v3843_v24  ;;  %2155 = vmatpush1.bf16.msra.mxu1 %v3529_v11  ;;  %v3588_v11 = vld [vmem:[%s4114_s0 + $0xa8] sm:$0xff]  }
 0x84c   : > { %v1565_v46 = vpop.f32.mrf.mxu1 }
 0x84d   : > { %1792 = vrot.lane.b32.xlu1 %v1565_v46, %s3846_s15  ;;  %v3573_v46 = vld [vmem:[%s4104_s4 + $0x4] ss:$16 sps:$4 sm:$0xff]  }
 0x84e   : > { %v3283_v47 = vpop.f32.mrf.mxu1 }
 0x84f   : > { %v3576_v47 = vld [vmem:[%s4104_s4 + $0xc] ss:$16 sps:$4 sm:$0xff]  }
 0x850   : > { %v1568_v50 = vpop.f32.mrf.mxu1 }
 0x851   : > { %v3574_v50 = vld [vmem:[%s4104_s4 + $0x8] ss:$16 sps:$4 sm:$0xff]  }
 0x852   : > { %v3284_v51 = vpop.f32.mrf.mxu1 }
 0x854   : > { %v1675_v52 = vpop.f32.mrf.mxu1 }
 0x855   : > { %1796 = vrot.lane.b32.xlu0 %v1675_v52, %s3848_s23 }
 0x856   : > { %v3295_v53 = vpop.f32.mrf.mxu1 }
 0x858   : > { %v1678_v54 = vpop.f32.mrf.mxu1 }
 0x859   : > { %v1931_v54 = vsub.s32 4, %v4171_v37 }
 0x85a   : > { %v3296_v55 = vpop.f32.mrf.mxu1 }
 0x85b   : > { %v1936_v55 = vsub.s32 5, %v4171_v37 }
 0x85c   : > { %v1785_v56 = vpop.f32.mrf.mxu1 }
 0x85d   : > { %1800 = vrot.lane.b32.xlu1 %v1785_v56, %s3845_s2  ;;  %v1932_v56 = vrot.slane %v4178_v39, %v1931_v54 }
 0x85e   : > { %v3307_v57 = vpop.f32.mrf.mxu1 }
 0x860   : > { %v1788_v58 = vpop.f32.mrf.mxu1 }
 0x862   : > { %v3308_v59 = vpop.f32.mrf.mxu1 }
 0x863   : > { %v1937_v59 = vrot.slane %v4178_v39, %v1936_v55  ;;  %v3581_v39 = vld [vmem:[%s4114_s0 + $0x70] sm:$0xff]  }
 0x8bf   : > { %v1793_v60 = vpop.permute.xlu1 %1792 }
 0x8c0   : > { %v1803_v5 = vsel %vm1351_vm2, %v4238_v41, %v1793_v60 }
 0x8c7   : > { %v1797_v61 = vpop.permute.xlu0 %1796 }
 0x8c8   : > { %v1805_v62 = vsel %vm1804_vm6, %v1803_v5, %v1797_v61 }
 0x8cf   : > { %v1801_v63 = vpop.permute.xlu1 %1800 }
 0x8d0   : > { %v1807_v0 = vsel %vm1806_vm7, %v1805_v62, %v1801_v63  ;;  %v3577_v62 = vld [vmem:[%s4114_s0 + $0x78] sm:$0xff]  }
 0x8d1   : > { %v1808_v1 = vpack.c.bf16 %v1807_v0, %v1807_v0  ;;  %v3578_v63 = vld [vmem:[%s4114_s0 + $0xf8] sm:$0xff]  }
 0x8d2   : > { %v3579_v0 = vld [vmem:[%s4114_s0 + $0x38] sm:$0xff]  }
 0x8d3   : > { %3326 = vmatmul.mubr.bf16.vlgmr.msra.gmra.mxu0 %v1808_v1  ;;  %v3580_v1 = vld [vmem:[%s4114_s0 + $0xb8] sm:$0xff]  }
 0x8d4   : > { %2227 = vmatprep.mubr.bf16.mxu0 %v3843_v24  ;;  %v3537_v24 = vld [vmem:[%s4104_s4 + $0xc4] ss:$16 sps:$4 sm:$0xff]   ;;  %2196 = vmatpush1.bf16.msra.mxu0 %v3532_v13 }
 0x8d5   : > { %2156 = vmatprep.subr.bf16.mxu1 %v3537_v24  ;;  %2197 = vmatprep.subr.bf16.mxu0 %v3540_v15  ;;  %v3590_v13 = vld [vmem:[%s4114_s0 + $0xe0] sm:$0xff]   ;;  %v3593_v15 = vld [vmem:[%s4114_s0 + $0x58] sm:$0xff]  }
 0x8d6   : > { %v3592_v24 = vld [vmem:[%s4114_s0 + $0xa0] sm:$0xff]  }
 0x8d8   : > { %2198 = vmatpush1.bf16.msra.mxu0 %v3538_v16  ;;  %v3595_v16 = vld [vmem:[%s4114_s0 + $0x18] sm:$0xff]  }
 0x8d9   : > { %2199 = vmatprep.subr.bf16.mxu0 %v3546_v22  ;;  %v3601_v22 = vld [vmem:[%s4114_s0 + $0x48] sm:$0xff]  }
 0x8dc   : > { %2200 = vmatpush1.bf16.msra.mxu0 %v3544_v25  ;;  %v3603_v25 = vld [vmem:[%s4114_s0 + $0x8] sm:$0xff]  }
 0x8dd   : > { %2201 = vmatprep.subr.bf16.mxu0 %v3552_v28  ;;  %v3607_v28 = vld [vmem:[%s4114_s0] sm:$0xff]  }
 0x8e0   : > { %2202 = vmatpush1.bf16.msra.mxu0 %v3550_v3  ;;  %v3606_v3 = vld [vmem:[%s4114_s0 + $0xc0] sm:$0xff]  }
 0x8e1   : > { %2203 = vmatprep.subr.bf16.mxu0 %v3558_v30  ;;  %v1972_v30 = vld [vmem:[%s4109_s3] sm:$0xf] }
 0x8e4   : > { %2204 = vmatpush1.bf16.msra.mxu0 %v3556_v32  ;;  %v1977_v32 = vrot.slane %v1972_v30, %v4174_v38 }
 0x8e5   : > { %2205 = vmatprep.subr.bf16.mxu0 %v3564_v34 }
 0x8e8   : > { %2206 = vmatpush1.bf16.msra.mxu0 %v3562_v36  ;;  %v1981_v36 = vrot.slane %v1972_v30, %v4181_v40 }
 0x8e9   : > { %2207 = vmatprep.subr.bf16.mxu0 %v3570_v43 }
 0x8ec   : > { %2208 = vmatpush1.bf16.msra.mxu0 %v3568_v45 }
 0x8ed   : > { %2209 = vmatprep.subr.bf16.mxu0 %v3576_v47 }
 0x8f0   : > { %2210 = vmatpush1.bf16.msra.mxu0 %v3574_v50 }
 0x8f1   : > { %3199 = vmatprep.subr.bf16.mxu0 %v3578_v63 }
 0x993   : > { %v1911_v6 = vpop.f32.mrf.mxu0 }
 0x994   : > { %v1912_v7 = vadd.f32 %v1911_v6, %v1828_v4  ;;  %v3582_v4 = vld [vmem:[%s4114_s0 + $0xf0] sm:$0xff]  }
 0x995   : > { %v3327_v8 = vpop.f32.mrf.mxu0  ;;  %v3583_v6 = vld [vmem:[%s4114_s0 + $0x30] sm:$0xff]  }
 0x996   : > { %v4291_v41 = vadd.f32 %v1912_v7, %v4130_v2  ;;  %v3535_v2 = vld [vmem:[%s4104_s4 + $0xc0] ss:$16 sps:$4 sm:$0xff]   ;;  %v3585_v8 = vld [vmem:[%s4114_s0 + $0x68] sm:$0xff]  }
 0x997   : > { %v1914_v9 = vpop.f32.mrf.mxu0  ;;  %2157 = vmatpush1.bf16.msra.mxu1 %v3535_v2  ;;  %v3584_v7 = vld [vmem:[%s4114_s0 + $0xb0] sm:$0xff]   ;;  %v3594_v2 = vld [vmem:[%s4114_s0 + $0xd8] sm:$0xff]  }
 0x998   : > { %1918 = vadd.xlane.f32.xlu0 %v4291_v41  ;;  %2158 = vmatprep.subr.bf16.mxu1 %v3543_v21  ;;  %v3586_v9 = vld [vmem:[%s4114_s0 + $0xe8] sm:$0xff]   ;;  %v3600_v21 = vld [vmem:[%s4114_s0 + $0x90] sm:$0xff]  }
 0x999   : > { %v3328_v10 = vpop.f32.mrf.mxu0 }
 0x99a   : > { %v3587_v10 = vld [vmem:[%s4114_s0 + $0x28] sm:$0xff]  }
 0x99b   : > { %2159 = vmatpush1.bf16.msra.mxu1 %v3541_v23  ;;  %v3602_v23 = vld [vmem:[%s4114_s0 + $0xc8] sm:$0xff]  }
 0x99c   : > { %2160 = vmatprep.subr.bf16.mxu1 %v3549_v27  ;;  %v3605_v27 = vld [vmem:[%s4114_s0 + $0x40] sm:$0xff]  }
 0x99f   : > { %2161 = vmatpush1.bf16.msra.mxu1 %v3547_v26  ;;  %v3604_v26 = vld [vmem:[%s4114_s0 + $0x88] sm:$0xff]  }
 0x9a0   : > { %2162 = vmatprep.subr.bf16.mxu1 %v3555_v29  ;;  %v3608_v29 = vld [vmem:[%s4114_s0 + $0x80] sm:$0xff]  }
 0x9a3   : > { %2163 = vmatpush1.bf16.msra.mxu1 %v3553_v31  ;;  %v1988_v31 = vsub.s32 3, %v4171_v37 }
 0x9a4   : > { %2164 = vmatprep.subr.bf16.mxu1 %v3561_v33  ;;  %v1985_v33 = vrot.slane %v1972_v30, %v4193_v49 }
 0x9a7   : > { %2165 = vmatpush1.bf16.msra.mxu1 %v3559_v35 }
 0x9a8   : > { %2166 = vmatprep.subr.bf16.mxu1 %v3567_v42  ;;  %v1989_v42 = vrot.slane %v1972_v30, %v1988_v31 }
 0x9ab   : > { %2167 = vmatpush1.bf16.msra.mxu1 %v3565_v44 }
 0x9ac   : > { %2168 = vmatprep.subr.bf16.mxu1 %v3573_v46 }
 0x9af   : > { %2169 = vmatpush1.bf16.msra.mxu1 %v3571_v48 }
 0x9b0   : > { %3177 = vmatprep.subr.bf16.mxu1 %v3577_v62 }
 0xa21   : > { %v1919_v17 = vpop.xlane.xlu0 %1918 }
 0xa22   : > { %v1920_v18 = vmul.f32 0.0078125, %v1919_v17  ;;  %v3596_v17 = vld [vmem:[%s4114_s0 + $0x98] sm:$0xff]  }
 0xa24   : > { %v1921_v19 = vsub.f32 %v4291_v41, %v1920_v18  ;;  %v3597_v18 = vld [vmem:[%s4114_s0 + $0x50] sm:$0xff]  }
 0xa26   : > { %v1922_v20 = vmul.f32 %v1921_v19, %v1921_v19 }
 0xa28   : > { %1923 = vadd.xlane.f32.xlu1 %v1922_v20  ;;  %v3599_v20 = vld [vmem:[%s4114_s0 + $0x10] sm:$0xff]  }
 0xab1   : > { %v1924_v51 = vpop.xlane.xlu1 %1923 }
 0xab2   : > { %v1925_v52 = vmul.f32 0.0078125, %v1924_v51 }
 0xab4   : > { %v1926_v53 = vadd.f32 1e-06, %v1925_v52 }
 0xab6   : > { %3627 = vrsqrt.f32 %v1926_v53 }
 0xac3   : > { %v3628_v57 = vpop.eup %3627 }
 0xac4   : > { %v1928_v58 = vmul.f32 %v3628_v57, %v1921_v19  ;;  %v3598_v19 = vld [vmem:[%s4114_s0 + $0xd0] sm:$0xff]   ;;  %s4486_s0 = smov %s4485_s11 }
 0xac6   : > { %v1933_v60 = vmul.f32 %v1932_v56, %v1928_v58 }
 0xac8   : > { %v1938_v61 = vadd.f32 %v1937_v59, %v1933_v60 }
 0xaca   : > { %v1939_v5 = vpack.c.bf16 %v1938_v61, %v1938_v61 }
 0xacc   : > { %2187 = vmatmul.mubr.bf16.vlgmr.msra.gmra.mxu1 %v1939_v5  ;;  %2228 = vmatmul.mubr.bf16.vlgmr.msra.gmra.mxu0 %v1939_v5 }
 0xacd   : > { %3178 = vmatpush3.bf16.msra.mxu1 %v3579_v0  ;;  %3200 = vmatpush3.bf16.msra.mxu0 %v3580_v1 }
 0xace   : > { %3179 = vmatprep.subr.bf16.mxu1 %v3581_v39  ;;  %3201 = vmatprep.subr.bf16.mxu0 %v3582_v4 }
 0xad1   : > { %3180 = vmatpush3.bf16.msra.mxu1 %v3583_v6  ;;  %3202 = vmatpush3.bf16.msra.mxu0 %v3584_v7 }
 0xad2   : > { %3181 = vmatprep.subr.bf16.mxu1 %v3585_v8  ;;  %3203 = vmatprep.subr.bf16.mxu0 %v3586_v9 }
 0xad5   : > { %3182 = vmatpush3.bf16.msra.mxu1 %v3587_v10  ;;  %3204 = vmatpush3.bf16.msra.mxu0 %v3588_v11 }
 0xad6   : > { %3183 = vmatprep.subr.bf16.mxu1 %v3589_v12  ;;  %3205 = vmatprep.subr.bf16.mxu0 %v3590_v13 }
 0xad9   : > { %3184 = vmatpush3.bf16.msra.mxu1 %v3591_v14  ;;  %3206 = vmatpush3.bf16.msra.mxu0 %v3592_v24 }
 0xada   : > { %3185 = vmatprep.subr.bf16.mxu1 %v3593_v15  ;;  %3207 = vmatprep.subr.bf16.mxu0 %v3594_v2 }
 0xadd   : > { %3186 = vmatpush3.bf16.msra.mxu1 %v3595_v16  ;;  %3208 = vmatpush3.bf16.msra.mxu0 %v3596_v17 }
 0xade   : > { %3187 = vmatprep.subr.bf16.mxu1 %v3597_v18  ;;  %3209 = vmatprep.subr.bf16.mxu0 %v3598_v19 }
 0xae1   : > { %3188 = vmatpush3.bf16.msra.mxu1 %v3599_v20  ;;  %3210 = vmatpush3.bf16.msra.mxu0 %v3600_v21 }
 0xae2   : > { %3189 = vmatprep.subr.bf16.mxu1 %v3601_v22  ;;  %3211 = vmatprep.subr.bf16.mxu0 %v3602_v23 }
 0xae5   : > { %3190 = vmatpush3.bf16.msra.mxu1 %v3603_v25  ;;  %3212 = vmatpush3.bf16.msra.mxu0 %v3604_v26 }
 0xae6   : > { %3191 = vmatprep.subr.bf16.mxu1 %v3605_v27  ;;  %3213 = vmatprep.subr.bf16.mxu0 %v3606_v3 }
 0xae9   : > { %3192 = vmatpush3.bf16.msra.mxu1 %v3607_v28  ;;  %3214 = vmatpush3.bf16.msra.mxu0 %v3608_v29 }
 0xb8c   : > { %v2188_v34 = vpop.f32.mrf.mxu1  ;;  %v2229_v35 = vpop.f32.mrf.mxu0 }
 0xb8d   : > { %v4368_v43 = vadd.f32 %v2188_v34, %v1977_v32  ;;  %v4370_v44 = vadd.f32 %v2229_v35, %v1985_v33 }
 0xb8e   : > { %v2190_v45 = vpop.f32.mrf.mxu1  ;;  %v2231_v46 = vpop.f32.mrf.mxu0 }
 0xb8f   : > { %v4373_v47 = vmul.f32 0.70710677, %v4368_v43  ;;  %v4376_v48 = vmul.f32 0.70710677, %v4370_v44  ;;  %v4378_v50 = vadd.f32 %v2190_v45, %v1981_v36  ;;  %v4380_v49 = vadd.f32 %v2231_v46, %v1989_v42 }
 0xb90   : > { %v2192_v51 = vpop.f32.mrf.mxu1  ;;  %v2233_v52 = vpop.f32.mrf.mxu0 }
 0xb91   : > { %v2244_v53 = vand.u32 2147483647, %v4373_v47  ;;  %v2246_v54 = vand.u32 2147483647, %v4376_v48  ;;  %v4385_v55 = vmul.f32 0.70710677, %v4378_v50 }
 0xb92   : > { %v4388_v56 = vmul.f32 0.70710677, %v4380_v49  ;;  %v2193_v57 = vpop.f32.mrf.mxu1  ;;  %v2234_v58 = vpop.f32.mrf.mxu0  ;;  %vm2324_vm8 = vcmp.ge.f32.partialorder %v4373_v47, 0.0  ;;  %vm2326_vm9 = vcmp.ge.f32.partialorder %v4376_v48, 0.0  ;;  %v2238_v48 = vmul.f32 0.5, %v4370_v44  ;;  %v3645_v44 = vld [vmem:[%s4486_s0] sm:$0xff] }
 0xb93   : > { %v2248_v59 = vmul.f32 0.3275911, %v2244_v53  ;;  %v2250_v60 = vmul.f32 0.3275911, %v2246_v54  ;;  %v2245_v61 = vand.u32 2147483647, %v4385_v55 }
 0xb94   : > { %v2247_v5 = vand.u32 2147483647, %v4388_v56  ;;  %v2300_v6 = vsub.f32 0.0, %v2244_v53  ;;  %v2302_v7 = vsub.f32 0.0, %v2246_v54  ;;  %vm2325_vm10 = vcmp.ge.f32.partialorder %v4385_v55, 0.0 }
 0xb95   : > { %v2252_v62 = vadd.f32 1.0, %v2248_v59  ;;  %v2254_v63 = vadd.f32 1.0, %v2250_v60  ;;  %v2249_v0 = vmul.f32 0.3275911, %v2245_v61  ;;  %v2301_v9 = vsub.f32 0.0, %v2245_v61 }
 0xb96   : > { %v2251_v1 = vmul.f32 0.3275911, %v2247_v5  ;;  %v2304_v8 = vmul.f32 %v2300_v6, %v2244_v53  ;;  %v2306_v10 = vmul.f32 %v2302_v7, %v2246_v54  ;;  %v2303_v11 = vsub.f32 0.0, %v2247_v5 }
 0xb97   : > { %3629 = vrcp.f32 %v2252_v62  ;;  %v2253_v39 = vadd.f32 1.0, %v2249_v0  ;;  %v2305_v15 = vmul.f32 %v2301_v9, %v2245_v61  ;;  %vm2327_vm11 = vcmp.ge.f32.partialorder %v4388_v56, 0.0 }
 0xb98   : > { %3631 = vrcp.f32 %v2254_v63  ;;  %v2255_v4 = vadd.f32 1.0, %v2251_v1  ;;  %v2308_v24 = vmul.f32 1.442695, %v2304_v8  ;;  %v2312_v16 = vmul.f32 1.442695, %v2306_v10 }
 0xb99   : > { %3633 = vrcp.f32 %v2253_v39  ;;  %v2307_v17 = vmul.f32 %v2303_v11, %v2247_v5  ;;  %v2310_v22 = vmul.f32 1.442695, %v2305_v15 }
 0xb9a   : > { %3635 = vrcp.f32 %v2255_v4 }
 0xb9b   : > { %3637 = vpow2.f32 %v2308_v24  ;;  %v2314_v27 = vmul.f32 1.442695, %v2307_v17 }
 0xb9c   : > { %3639 = vpow2.f32 %v2312_v16 }
 0xb9d   : > { %3641 = vpow2.f32 %v2310_v22 }
 0xb9e   : > { %3643 = vpow2.f32 %v2314_v27  ;;  %v2237_v27 = vmul.f32 0.5, %v4378_v50  ;;  %v2414_v50 = vsub.s32 6, %v4171_v37 }
 0xba4   : > { %v3630_v12 = vpop.eup %3629 }
 0xba5   : > { %v3632_v13 = vpop.eup %3631  ;;  %v2264_v14 = vmul.f32 1.0614054, %v3630_v12 }
 0xba6   : > { %v2266_v2 = vmul.f32 1.0614054, %v3632_v13  ;;  %v3634_v19 = vpop.eup %3633 }
 0xba7   : > { %v2268_v18 = vadd.f32 -1.4531521, %v2264_v14  ;;  %v2265_v23 = vmul.f32 1.0614054, %v3634_v19  ;;  %v3636_v25 = vpop.eup %3635 }
 0xba8   : > { %v2270_v20 = vadd.f32 -1.4531521, %v2266_v2  ;;  %v2267_v29 = vmul.f32 1.0614054, %v3636_v25  ;;  %v3638_v62 = vpop.eup %3637 }
 0xba9   : > { %v2272_v21 = vmul.f32 %v3630_v12, %v2268_v18  ;;  %v2269_v28 = vadd.f32 -1.4531521, %v2265_v23  ;;  %v3640_v0 = vpop.eup %3639 }
 0xbaa   : > { %v2274_v26 = vmul.f32 %v3632_v13, %v2270_v20  ;;  %v2271_v33 = vadd.f32 -1.4531521, %v2267_v29  ;;  %v3642_v10 = vpop.eup %3641  ;;  %v2239_v29 = vmul.f32 0.5, %v4380_v49 }
 0xbab   : > { %v2276_v3 = vadd.f32 1.4214138, %v2272_v21  ;;  %v2273_v32 = vmul.f32 %v3634_v19, %v2269_v28  ;;  %v3644_v2 = vpop.eup %3643 }
 0xbac   : > { %v2278_v30 = vadd.f32 1.4214138, %v2274_v26  ;;  %v2275_v42 = vmul.f32 %v3636_v25, %v2271_v33 }
 0xbad   : > { %v2280_v31 = vmul.f32 %v3630_v12, %v2276_v3  ;;  %v2277_v36 = vadd.f32 1.4214138, %v2273_v32 }
 0xbae   : > { %v2282_v34 = vmul.f32 %v3632_v13, %v2278_v30  ;;  %v2279_v52 = vadd.f32 1.4214138, %v2275_v42 }
 0xbaf   : > { %v2284_v35 = vadd.f32 -0.28449672, %v2280_v31  ;;  %v2281_v51 = vmul.f32 %v3634_v19, %v2277_v36  ;;  %v2415_v36 = vrot.slane %v3645_v44, %v2414_v50 }
 0xbb0   : > { %v2286_v45 = vadd.f32 -0.28449672, %v2282_v34  ;;  %v2283_v58 = vmul.f32 %v3636_v25, %v2279_v52 }
 0xbb1   : > { %v2288_v46 = vmul.f32 %v3630_v12, %v2284_v35  ;;  %v2285_v57 = vadd.f32 -0.28449672, %v2281_v51 }
 0xbb2   : > { %v2290_v53 = vmul.f32 %v3632_v13, %v2286_v45  ;;  %v2287_v5 = vadd.f32 -0.28449672, %v2283_v58 }
 0xbb3   : > { %v2292_v54 = vadd.f32 0.2548296, %v2288_v46  ;;  %v2289_v61 = vmul.f32 %v3634_v19, %v2285_v57 }
 0xbb4   : > { %v2294_v59 = vadd.f32 0.2548296, %v2290_v53  ;;  %v2291_v4 = vmul.f32 %v3636_v25, %v2287_v5 }
 0xbb5   : > { %v2296_v60 = vmul.f32 %v3630_v12, %v2292_v54  ;;  %v2293_v39 = vadd.f32 0.2548296, %v2289_v61 }
 0xbb6   : > { %v2298_v63 = vmul.f32 %v3632_v13, %v2294_v59  ;;  %v2295_v9 = vadd.f32 0.2548296, %v2291_v4 }
 0xbb7   : > { %v2316_v1 = vmul.f32 %v3638_v62, %v2296_v60  ;;  %v2297_v8 = vmul.f32 %v3634_v19, %v2293_v39  ;;  %v2236_v19 = vmul.f32 0.5, %v4368_v43 }
 0xbb8   : > { %v2318_v6 = vmul.f32 %v3640_v0, %v2298_v63  ;;  %v2299_v15 = vmul.f32 %v3636_v25, %v2295_v9 }
 0xbb9   : > { %v2320_v7 = vsub.f32 1.0, %v2316_v1  ;;  %v2317_v24 = vmul.f32 %v3642_v10, %v2297_v8 }
 0xbba   : > { %v2322_v11 = vsub.f32 1.0, %v2318_v6  ;;  %v2319_v17 = vmul.f32 %v3644_v2, %v2299_v15 }
 0xbbb   : > { %v2328_v14 = vsub.f32 0.0, %v2320_v7  ;;  %v2321_v13 = vsub.f32 1.0, %v2317_v24 }
 0xbbc   : > { %v2330_v12 = vsub.f32 0.0, %v2322_v11  ;;  %v2323_v22 = vsub.f32 1.0, %v2319_v17 }
 0xbbd   : > { %v2332_v16 = vsel %vm2324_vm8, %v2320_v7, %v2328_v14  ;;  %v2329_v21 = vsub.f32 0.0, %v2321_v13 }
 0xbbe   : > { %v2334_v18 = vsel %vm2326_vm9, %v2322_v11, %v2330_v12  ;;  %v2336_v20 = vadd.f32 1.0, %v2332_v16  ;;  %v2331_v25 = vsub.f32 0.0, %v2323_v22 }
 0xbbf   : > { %v2338_v23 = vadd.f32 1.0, %v2334_v18  ;;  %v2333_v26 = vsel %vm2325_vm10, %v2321_v13, %v2329_v21 }
 0xbc0   : > { %v2337_v47 = vadd.f32 1.0, %v2333_v26  ;;  %v2340_v3 = vmul.f32 %v2336_v20, %v2236_v19  ;;  %v2335_v28 = vsel %vm2327_vm11, %v2323_v22, %v2331_v25 }
 0xbc1   : > { %v2339_v31 = vadd.f32 1.0, %v2335_v28  ;;  %v2342_v55 = vmul.f32 %v2338_v23, %v2238_v48 }
 0xbc2   : > { %v2341_v30 = vmul.f32 %v2337_v47, %v2237_v27  ;;  %v2344_v33 = vpack.c.bf16 %v2340_v3, %v2340_v3 }
 0xbc3   : > { %v2343_v43 = vmul.f32 %v2339_v31, %v2239_v29  ;;  %v2346_v35 = vpack.c.bf16 %v2342_v55, %v2342_v55 }
 0xbc4   : > { %v2345_v32 = vpack.c.bf16 %v2341_v30, %v2341_v30 }
 0xbc5   : > { %v2347_v34 = vpack.c.bf16 %v2343_v43, %v2343_v43 }
 0xbc6   : > { %2640 = vmatprep.mubr.bf16.mxu1 %v2345_v32 }
 0xbc7   : > { %2641 = vmatmul.mubr.bf16.vlgmr.msra.gmra.mxu1 %v2344_v33  ;;  %2680 = vmatprep.mubr.bf16.mxu0 %v2347_v34 }
 0xbc8   : > { %2681 = vmatmul.mubr.bf16.vlgmr.msra.gmra.mxu0 %v2346_v35 }
 0xc87   : > { %v3193_v56 = vpop.f32.mrf.mxu1 }
 0xc88   : > { %v3215_v42 = vpop.f32.mrf.mxu0 }
 0xc89   : > { %v3194_v49 = vpop.f32.mrf.mxu1 }
 0xc8a   : > { %v3195_v45 = vadd.f32 %v3194_v49, %v3193_v56  ;;  %v3216_v46 = vpop.f32.mrf.mxu0 }
 0xc8b   : > { %v3196_v51 = vpop.f32.mrf.mxu1  ;;  %v3217_v53 = vadd.f32 %v3216_v46, %v3215_v42 }
 0xc8c   : > { %v2643_v52 = vadd.f32 %v3195_v45, %v2415_v36  ;;  %v3218_v54 = vpop.f32.mrf.mxu0  ;;  %2692 = sbr.rel (%p3083_p1) target bundleno = 3219 (0xc93), region = 88 }
 0xc8d   : > { %v3197_v57 = vpop.f32.mrf.mxu1 }
 0xc8e   : > { %v2683_v58 = vadd.f32 %v3217_v53, %v2643_v52  ;;  %v3219_v59 = vpop.f32.mrf.mxu0 }
 0xc90   : > { %v2688_v60 = vadd.f32 %v2683_v58, %v4291_v41 }
 0xc92   : > { %2693 = vst [vmem:[%s4119_s5] sm:$0xff] %v2688_v60 }
 0xc93 PF: > { %p3084_p4 = scmp.ne.s32.totalorder %s3814_s20, 1 }
 0xc95   : > { %2697 = sbr.rel (%p3084_p4) target bundleno = 3533 (0xdcd), region = 92 }
 0xc9a   : > { %2699 = vadd.xlane.f32.xlu0 %v2688_v60  ;;  %v2698_v41 = vld [vmem:[#allocation7] sm:$0x3] }
 0xc9b   : > { %v2713_v39 = vrot.slane %v2698_v41, %v4174_v38  ;;  %v2718_v7 = vrot.slane %v2698_v41, %v4181_v40 }
 0xd23   : > { %v2700_v37 = vpop.xlane.xlu0 %2699 }
 0xd24   : > { %v2701_v61 = vmul.f32 0.0078125, %v2700_v37 }
 0xd26   : > { %v2702_v5 = vsub.f32 %v2688_v60, %v2701_v61 }
 0xd28   : > { %v2703_v62 = vmul.f32 %v2702_v5, %v2702_v5 }
 0xd2a   : > { %2704 = vadd.xlane.f32.xlu0 %v2703_v62 }
 0xdb3   : > { %v2705_v63 = vpop.xlane.xlu0 %2704 }
 0xdb4   : > { %v2706_v0 = vmul.f32 0.0078125, %v2705_v63 }
 0xdb6   : > { %v2707_v1 = vadd.f32 1e-06, %v2706_v0 }
 0xdb8   : > { %3646 = vrsqrt.f32 %v2707_v1 }
 0xdc5   : > { %v3647_v4 = vpop.eup %3646 }
 0xdc6   : > { %v2709_v6 = vmul.f32 %v3647_v4, %v2702_v5 }
 0xdc8   : > { %v2714_v8 = vmul.f32 %v2713_v39, %v2709_v6 }
 0xdca   : > { %v2719_v9 = vadd.f32 %v2718_v7, %v2714_v8 }
 0xdcc   : > { %2720 = vst [vmem:[%s4119_s5] sm:$0xff] %v2719_v9 }
 0xdcd PF: > { %s26_s24 = sadd.s32 1, %s3830_s24   ;;  %s4487_s4 = sld [smem:[#allocation15_spill]] }
 0xdce   : > { %p23_p8 = scmp.ge.s32.totalorder %s26_s24, 6   ;;  %s4488_s21 = sld [smem:[#allocation12_spill]] }
 0xdcf   : > { %s4489_s27 = sld [smem:[#allocation13_spill]]  ;;  %s4491_s17 = smov %s3806_s18 }
 0xdd0   : > { %s4490_s23 = sld [smem:[#allocation14_spill]]  ;;  %s4492_s18 = smov %s3810_s19 }
 0xdd1   : > { %s4494_s20 = smov %s3822_s22  ;;  %25 = sbr.rel (!%p23_p8) target bundleno = 17 (0x11), region = 154 }
 0xdd3   : > { %s4493_s19 = smov %s4487_s4 }
 0xdd5   : > { %s4495_s22 = smov %s4489_s27 }
 0xdd6   :  { %2740 = vsyncpa [#allocation3], 1 }
 0xdd7   :  { %2742 = vsyncpa [#allocation3 + $0x1], 1 }
 0xdd8   :  { %2743 = vsyncpa [#allocation5], 1 }
 0xdd9   :  { %2745 = vsyncpa [#allocation5 + $0x1], 1 }
 0xdda   :  { %2746 = vsyncpa [#allocation8], 1 }

</bundles_post_ra>
